<compile_context>
chip_gen: v5e
topology: v5e:2x2
jax: 0.10.0
libtpu: 0.0.40
codegen_flags: <defaults>
</compile_context>

<pallas_src>
import jax
import jax.numpy as jnp
import numpy as np
from jax.experimental import pallas as pl
from jax.experimental.pallas import tpu as pltpu


# ---------------------------------------------------------------------------
# Fused kernel: GCN (pos+neg stacked) + bilinear discriminator, one invocation.
# ---------------------------------------------------------------------------
def _ane_kernel(scal_ref, feat_ref, adj_ref, w_ref, b_ref, wb1_ref, wb2_ref,
                rdt_ref, rec_ref):
    """
    scal_ref : SMEM (3,) f32 = [prelu_alpha, bilinear_bias_1, bilinear_bias_2]
    feat_ref : (2B, N, F_in)  rows 0..B-1 = positive subgraphs, B..2B-1 = negative
    adj_ref  : (2B, N, N)     dense symmetric adjacency, no self loops
    w_ref    : (F_in, 2*F_out)  fused [w1 | w2]
    b_ref    : (1, 2*F_out)     fused [b1 | b2]
    wb1_ref, wb2_ref : (F_out, F_out) bilinear discriminator weights
    rdt_ref, rec_ref : (2B, 1) output scores (rows 0..B-1 pos, B..2B-1 neg)
    """
    alpha = scal_ref[0]
    bb1 = scal_ref[1]
    bb2 = scal_ref[2]

    feat = feat_ref[...]                       # (G, N, F_in)
    A = adj_ref[...]                           # (G, N, N)
    W = w_ref[...]                             # (F_in, 2*F_out)
    bias = b_ref[...]                          # (1, 2*F_out)

    G, N, F_in = feat.shape
    B = G // 2
    F2 = W.shape[1]
    F_out = F2 // 2

    # Anchor (target node, index 0) features; zero them out for the conv,
    # exactly as the PyTorch module does (g.ndata['feat'][0, :] = 0).
    anchors = feat[:, 0, :]                                          # (G, F_in)
    node_id = jax.lax.broadcasted_iota(jnp.int32, feat.shape, 1)
    x_z = jnp.where(node_id == 0, 0.0, feat)

    # GraphConv(norm='both'): D_in^{-1/2} A D_out^{-1/2} x, degrees clamped to >= 1.
    # Subgraphs are undirected (symmetric adj), so one degree reduction serves both
    # sides; the scaling is applied to the features to avoid any transpose of deg.
    deg = jnp.maximum(jnp.sum(A, axis=2, keepdims=True), 1.0)        # (G, N, 1)
    inv_sqrt = jax.lax.rsqrt(deg)                                    # (G, N, 1)
    h_agg = inv_sqrt * jnp.einsum("bnm,bmf->bnf", A, inv_sqrt * x_z,
                                  preferred_element_type=jnp.float32)  # (G, N, F_in)

    # One fused MXU matmul: [all aggregated node rows ; all anchor rows] @ [w1|w2].
    rows = jnp.concatenate([h_agg.reshape(G * N, F_in), anchors], axis=0)
    z = jnp.dot(rows, W, preferred_element_type=jnp.float32) + bias  # (G*N+G, 2*F_out)
    z = jnp.where(z >= 0, z, alpha * z)                              # PReLU

    h = z[:G * N].reshape(G, N, F2)                                  # (G, N, 2*F_out)
    anc = z[G * N:]                                                  # (G, 2*F_out)
    h1, h2 = h[:, :, :F_out], h[:, :, F_out:]
    a1, a2 = anc[:, :F_out], anc[:, F_out:]

    # Subgraph pooling over nodes 1..N-1 ; recovery embedding = node 0 of h2.
    # (Assumes dense, unpadded subgraphs of exactly N nodes, as in this test.)
    pool = (jnp.sum(h1, axis=1) - h1[:, 0, :]) * (1.0 / float(N - 1))  # (G, F_out)
    rec = h2[:, 0, :]                                                  # (G, F_out)

    def l2n(v):  # F.normalize(p=2, dim=1, eps=1e-12)
        ss = jnp.sum(v * v, axis=-1, keepdims=True)
        return v * jax.lax.rsqrt(jnp.maximum(ss, 1e-24))

    pool_n, rec_n, a1_n, a2_n = l2n(pool), l2n(rec), l2n(a1), l2n(a2)

    # Discriminator: both the pos and neg halves are scored against the POSITIVE
    # anchor embeddings (as in AneModel.forward).
    a1_t = jnp.concatenate([a1_n[:B], a1_n[:B]], axis=0)             # (G, F_out)
    a2_t = jnp.concatenate([a2_n[:B], a2_n[:B]], axis=0)

    rdt_ref[...] = jnp.sum(
        jnp.dot(pool_n, wb1_ref[...], preferred_element_type=jnp.float32) * a1_t,
        axis=-1, keepdims=True) + bb1
    rec_ref[...] = jnp.sum(
        jnp.dot(rec_n, wb2_ref[...], preferred_element_type=jnp.float32) * a2_t,
        axis=-1, keepdims=True) + bb2


# ---------------------------------------------------------------------------
# Wrapper: stack pos/neg, fuse parameters, single pallas_call.
# ---------------------------------------------------------------------------
def ane_model_forward(pos_feat, pos_adj, neg_feat, neg_adj, params):
    B, N, F_in = pos_feat.shape
    G = 2 * B

    feat_all = jnp.concatenate([pos_feat, neg_feat], axis=0)          # (2B, N, F_in)
    adj_all = jnp.concatenate([pos_adj, neg_adj], axis=0)             # (2B, N, N)
    w_fused = jnp.concatenate([params["w1"], params["w2"]], axis=1)   # (F_in, 2*F_out)
    b_fused = jnp.concatenate([params["b1"], params["b2"]], axis=1)   # (1, 2*F_out)
    scalars = jnp.concatenate([params["alpha"].reshape(-1),
                               params["bb"].reshape(-1)]).astype(jnp.float32)  # (3,)

    out_sds = jax.ShapeDtypeStruct((G, 1), jnp.float32)
    vmem = pl.BlockSpec(memory_space=pltpu.MemorySpace.VMEM)
    smem = pl.BlockSpec(memory_space=pltpu.MemorySpace.SMEM)

    rdt, recs = pl.pallas_call(
        _ane_kernel,
        out_shape=(out_sds, out_sds),
        in_specs=[smem, vmem, vmem, vmem, vmem, vmem, vmem],
        out_specs=(vmem, vmem),
    )(scalars, feat_all, adj_all, w_fused, b_fused, params["wb1"], params["wb2"])

    # (pos_rdt, pos_rec, neg_rdt, neg_rec), each of shape (B,)
    return rdt[:B, 0], recs[:B, 0], rdt[B:, 0], recs[B:, 0]


# ---------------------------------------------------------------------------
# Pure-JAX reference (same math, no Pallas) for a sanity check.
# ---------------------------------------------------------------------------
def _ref_gcn(feat, adj, p):
    anchor = feat[:, 0, :]
    x = feat.at[:, 0, :].set(0.0)
    deg_in = jnp.maximum(adj.sum(axis=2, keepdims=True), 1.0)
    deg_out = jnp.maximum(adj.sum(axis=1, keepdims=True), 1.0)
    A_hat = adj / jnp.sqrt(deg_in) / jnp.sqrt(deg_out)
    h_agg = jnp.einsum("bnm,bmf->bnf", A_hat, x)
    alpha = p["alpha"][0, 0]
    prelu = lambda v: jnp.where(v >= 0, v, alpha * v)
    h1 = prelu(h_agg @ p["w1"] + p["b1"][0])
    h2 = prelu(h_agg @ p["w2"] + p["b2"][0])
    a1 = prelu(anchor @ p["w1"] + p["b1"][0])
    a2 = prelu(anchor @ p["w2"] + p["b2"][0])
    pool = h1[:, 1:, :].mean(axis=1)
    rec = h2[:, 0, :]
    l2 = lambda v: v / jnp.maximum(jnp.linalg.norm(v, axis=-1, keepdims=True), 1e-12)
    return l2(pool), l2(rec), l2(a1), l2(a2)


def _ref_forward(pos_feat, pos_adj, neg_feat, neg_adj, p):
    pp, pr, a1, a2 = _ref_gcn(pos_feat, pos_adj, p)
    np_, nr, _, _ = _ref_gcn(neg_feat, neg_adj, p)
    bil = lambda x1, W, x2, b: jnp.sum((x1 @ W) * x2, axis=-1) + b
    return (bil(pp, p["wb1"], a1, p["bb"][0, 0]),
            bil(pr, p["wb2"], a2, p["bb"][0, 1]),
            bil(np_, p["wb1"], a1, p["bb"][0, 0]),
            bil(nr, p["wb2"], a2, p["bb"][0, 1]))


# ---------------------------------------------------------------------------
def _xavier_uniform(key, shape):
    fan_in, fan_out = shape[0], shape[1]
    limit = float(np.sqrt(6.0 / (fan_in + fan_out)))
    return jax.random.uniform(key, shape, jnp.float32, -limit, limit)


if __name__ == "__main__":
    B, N, F_in, F_out = 8, 8, 32, 64

    key = jax.random.PRNGKey(0)
    k_feat_p, k_feat_n, k_adj_p, k_adj_n, k_w1, k_w2, k_wb1, k_wb2 = jax.random.split(key, 8)

    def make_adj(k):
        raw = (jax.random.uniform(k, (B, N, N)) < 0.4).astype(jnp.float32)
        sym = jnp.maximum(raw, jnp.swapaxes(raw, 1, 2))
        eye = jnp.eye(N, dtype=jnp.float32)[None]
        return sym * (1.0 - eye)

    pos_feat = jax.random.normal(k_feat_p, (B, N, F_in), jnp.float32)
    neg_feat = jax.random.normal(k_feat_n, (B, N, F_in), jnp.float32)
    pos_adj = make_adj(k_adj_p)
    neg_adj = make_adj(k_adj_n)

    params = {
        "w1": _xavier_uniform(k_w1, (F_in, F_out)),
        "w2": _xavier_uniform(k_w2, (F_in, F_out)),
        "b1": jnp.zeros((1, F_out), jnp.float32),
        "b2": jnp.zeros((1, F_out), jnp.float32),
        "alpha": jnp.full((1, 1), 0.25, jnp.float32),          # nn.PReLU() default
        "wb1": _xavier_uniform(k_wb1, (F_out, F_out)),          # nn.Bilinear weight[0]
        "wb2": _xavier_uniform(k_wb2, (F_out, F_out)),
        "bb": jnp.zeros((1, 2), jnp.float32),                   # bilinear biases (init 0)
    }

    outs = jax.jit(ane_model_forward)(pos_feat, pos_adj, neg_feat, neg_adj, params)
    outs = jax.block_until_ready(outs)

    refs = _ref_forward(pos_feat, pos_adj, neg_feat, neg_adj, params)
    for o, r in zip(outs, refs):
        np.testing.assert_allclose(np.asarray(o), np.asarray(r), rtol=5e-3, atol=5e-3)

    print("KERNEL_OK")
</pallas_src>

<mosaic_0001>
module attributes {stable_mosaic.version = 11 : i64} {
  func.func @_ane_kernel(%arg0: memref<3xf32, #tpu.memory_space<smem>>, %arg1: memref<16x8x32xf32, #tpu.memory_space<vmem>>, %arg2: memref<16x8x8xf32, #tpu.memory_space<vmem>>, %arg3: memref<32x128xf32, #tpu.memory_space<vmem>>, %arg4: memref<1x128xf32, #tpu.memory_space<vmem>>, %arg5: memref<64x64xf32, #tpu.memory_space<vmem>>, %arg6: memref<64x64xf32, #tpu.memory_space<vmem>>, %arg7: memref<16x1xf32, #tpu.memory_space<vmem>>, %arg8: memref<16x1xf32, #tpu.memory_space<vmem>>) attributes {dimension_semantics = [], scalar_prefetch = 0 : i64, scratch_operands = 0 : i64, tpu.core_type = #tpu.core_type<tc>} {
    %c0 = arith.constant 0 : index
    %0 = memref.load %arg0[%c0] : memref<3xf32, #tpu.memory_space<smem>>
    %c1 = arith.constant 1 : index
    %1 = memref.load %arg0[%c1] : memref<3xf32, #tpu.memory_space<smem>>
    %c2 = arith.constant 2 : index
    %2 = memref.load %arg0[%c2] : memref<3xf32, #tpu.memory_space<smem>>
    %c0_0 = arith.constant 0 : index
    %c0_1 = arith.constant 0 : index
    %c0_2 = arith.constant 0 : index
    %3 = vector.load %arg1[%c0_0, %c0_1, %c0_2] : memref<16x8x32xf32, #tpu.memory_space<vmem>>, vector<16x8x32xf32>
    %c0_3 = arith.constant 0 : index
    %c0_4 = arith.constant 0 : index
    %c0_5 = arith.constant 0 : index
    %4 = vector.load %arg2[%c0_3, %c0_4, %c0_5] : memref<16x8x8xf32, #tpu.memory_space<vmem>>, vector<16x8x8xf32>
    %c0_6 = arith.constant 0 : index
    %c0_7 = arith.constant 0 : index
    %5 = vector.load %arg3[%c0_6, %c0_7] : memref<32x128xf32, #tpu.memory_space<vmem>>, vector<32x128xf32>
    %c0_8 = arith.constant 0 : index
    %c0_9 = arith.constant 0 : index
    %6 = vector.load %arg4[%c0_8, %c0_9] : memref<1x128xf32, #tpu.memory_space<vmem>>, vector<1x128xf32>
    %7 = vector.extract_strided_slice %3 {offsets = [0, 0, 0], sizes = [16, 1, 32], strides = [1, 1, 1]} : vector<16x8x32xf32> to vector<16x1x32xf32>
    %8 = vector.shape_cast %7 : vector<16x1x32xf32> to vector<16x32xf32>
    %9 = tpu.iota {dimensions = array<i32: 1>} : vector<16x8x32xi32>
    %c0_i32 = arith.constant 0 : i32
    %10 = vector.broadcast %c0_i32 : i32 to vector<16x8x32xi32>
    %11 = arith.cmpi eq, %9, %10 : vector<16x8x32xi32>
    %cst = arith.constant 0.000000e+00 : f32
    %12 = vector.broadcast %cst : f32 to vector<16x8x32xf32>
    %13 = arith.select %11, %12, %3 : vector<16x8x32xi1>, vector<16x8x32xf32>
    %cst_10 = arith.constant dense<0.000000e+00> : vector<16x8xf32>
    %14 = vector.multi_reduction <add>, %4, %cst_10 [2] : vector<16x8x8xf32> to vector<16x8xf32>
    %15 = vector.shape_cast %14 : vector<16x8xf32> to vector<16x8x1xf32>
    %cst_11 = arith.constant 1.000000e+00 : f32
    %16 = vector.broadcast %cst_11 : f32 to vector<16x8x1xf32>
    %17 = arith.maximumf %15, %16 : vector<16x8x1xf32>
    %18 = math.rsqrt %17 : vector<16x8x1xf32>
    %19 = vector.broadcast %18 : vector<16x8x1xf32> to vector<16x8x32xf32>
    %20 = arith.mulf %19, %13 : vector<16x8x32xf32>
    "tpu.trace_start"() <{level = 10 : i32, message = "bnm,bmf->bnf"}> : () -> ()
    %cst_12 = arith.constant dense<0.000000e+00> : vector<16x8x32xf32>
    %21 = tpu.matmul %4, %20, %cst_12 {dimension_numbers = #tpu.dot_dimension_numbers<[2], [1], [1], [2], [0, 0, 0, 1, 1, 2], [0], [0]>} : vector<16x8x8xf32>, vector<16x8x32xf32>, vector<16x8x32xf32> -> vector<16x8x32xf32>
    "tpu.trace_stop"() : () -> ()
    %22 = vector.broadcast %18 : vector<16x8x1xf32> to vector<16x8x32xf32>
    %23 = arith.mulf %22, %21 : vector<16x8x32xf32>
    %24 = vector.shape_cast %23 : vector<16x8x32xf32> to vector<128x32xf32>
    %25 = tpu.concatenate %24, %8 in 0 : vector<128x32xf32>, vector<16x32xf32> -> vector<144x32xf32>
    %cst_13 = arith.constant dense<0.000000e+00> : vector<144x128xf32>
    %26 = tpu.matmul %25, %5, %cst_13 {dimension_numbers = #tpu.dot_dimension_numbers<[1], [0], [0], [1], [0, 0, 1, 1], [], []>} : vector<144x32xf32>, vector<32x128xf32>, vector<144x128xf32> -> vector<144x128xf32>
    %27 = vector.broadcast %6 : vector<1x128xf32> to vector<144x128xf32>
    %28 = arith.addf %26, %27 : vector<144x128xf32>
    %cst_14 = arith.constant 0.000000e+00 : f32
    %29 = vector.broadcast %cst_14 : f32 to vector<144x128xf32>
    %30 = arith.cmpf oge, %28, %29 : vector<144x128xf32>
    %31 = vector.broadcast %0 : f32 to vector<144x128xf32>
    %32 = arith.mulf %31, %28 : vector<144x128xf32>
    %33 = arith.select %30, %28, %32 : vector<144x128xi1>, vector<144x128xf32>
    %34 = vector.extract_strided_slice %33 {offsets = [0, 0], sizes = [128, 128], strides = [1, 1]} : vector<144x128xf32> to vector<128x128xf32>
    %35 = vector.shape_cast %34 : vector<128x128xf32> to vector<16x8x128xf32>
    %36 = vector.extract_strided_slice %33 {offsets = [128, 0], sizes = [16, 128], strides = [1, 1]} : vector<144x128xf32> to vector<16x128xf32>
    %37 = vector.extract_strided_slice %35 {offsets = [0, 0, 0], sizes = [16, 8, 64], strides = [1, 1, 1]} : vector<16x8x128xf32> to vector<16x8x64xf32>
    %38 = vector.extract_strided_slice %35 {offsets = [0, 0, 64], sizes = [16, 8, 64], strides = [1, 1, 1]} : vector<16x8x128xf32> to vector<16x8x64xf32>
    %39 = vector.extract_strided_slice %36 {offsets = [0, 0], sizes = [16, 64], strides = [1, 1]} : vector<16x128xf32> to vector<16x64xf32>
    %40 = vector.extract_strided_slice %36 {offsets = [0, 64], sizes = [16, 64], strides = [1, 1]} : vector<16x128xf32> to vector<16x64xf32>
    %cst_15 = arith.constant dense<0.000000e+00> : vector<16x64xf32>
    %41 = vector.multi_reduction <add>, %37, %cst_15 [1] : vector<16x8x64xf32> to vector<16x64xf32>
    %42 = vector.extract_strided_slice %37 {offsets = [0, 0, 0], sizes = [16, 1, 64], strides = [1, 1, 1]} : vector<16x8x64xf32> to vector<16x1x64xf32>
    %43 = vector.shape_cast %42 : vector<16x1x64xf32> to vector<16x64xf32>
    %44 = arith.subf %41, %43 : vector<16x64xf32>
    %cst_16 = arith.constant 0.142857149 : f32
    %45 = vector.broadcast %cst_16 : f32 to vector<16x64xf32>
    %46 = arith.mulf %44, %45 : vector<16x64xf32>
    %47 = vector.extract_strided_slice %38 {offsets = [0, 0, 0], sizes = [16, 1, 64], strides = [1, 1, 1]} : vector<16x8x64xf32> to vector<16x1x64xf32>
    %48 = vector.shape_cast %47 : vector<16x1x64xf32> to vector<16x64xf32>
    %49 = arith.mulf %46, %46 : vector<16x64xf32>
    %cst_17 = arith.constant dense<0.000000e+00> : vector<16xf32>
    %50 = vector.multi_reduction <add>, %49, %cst_17 [1] : vector<16x64xf32> to vector<16xf32>
    %51 = vector.shape_cast %50 : vector<16xf32> to vector<16x1xf32>
    %cst_18 = arith.constant 1.000000e-24 : f32
    %52 = vector.broadcast %cst_18 : f32 to vector<16x1xf32>
    %53 = arith.maximumf %51, %52 : vector<16x1xf32>
    %54 = math.rsqrt %53 : vector<16x1xf32>
    %55 = vector.broadcast %54 : vector<16x1xf32> to vector<16x64xf32>
    %56 = arith.mulf %46, %55 : vector<16x64xf32>
    %57 = arith.mulf %48, %48 : vector<16x64xf32>
    %cst_19 = arith.constant dense<0.000000e+00> : vector<16xf32>
    %58 = vector.multi_reduction <add>, %57, %cst_19 [1] : vector<16x64xf32> to vector<16xf32>
    %59 = vector.shape_cast %58 : vector<16xf32> to vector<16x1xf32>
    %cst_20 = arith.constant 1.000000e-24 : f32
    %60 = vector.broadcast %cst_20 : f32 to vector<16x1xf32>
    %61 = arith.maximumf %59, %60 : vector<16x1xf32>
    %62 = math.rsqrt %61 : vector<16x1xf32>
    %63 = vector.broadcast %62 : vector<16x1xf32> to vector<16x64xf32>
    %64 = arith.mulf %48, %63 : vector<16x64xf32>
    %65 = arith.mulf %39, %39 : vector<16x64xf32>
    %cst_21 = arith.constant dense<0.000000e+00> : vector<16xf32>
    %66 = vector.multi_reduction <add>, %65, %cst_21 [1] : vector<16x64xf32> to vector<16xf32>
    %67 = vector.shape_cast %66 : vector<16xf32> to vector<16x1xf32>
    %cst_22 = arith.constant 1.000000e-24 : f32
    %68 = vector.broadcast %cst_22 : f32 to vector<16x1xf32>
    %69 = arith.maximumf %67, %68 : vector<16x1xf32>
    %70 = math.rsqrt %69 : vector<16x1xf32>
    %71 = vector.broadcast %70 : vector<16x1xf32> to vector<16x64xf32>
    %72 = arith.mulf %39, %71 : vector<16x64xf32>
    %73 = arith.mulf %40, %40 : vector<16x64xf32>
    %cst_23 = arith.constant dense<0.000000e+00> : vector<16xf32>
    %74 = vector.multi_reduction <add>, %73, %cst_23 [1] : vector<16x64xf32> to vector<16xf32>
    %75 = vector.shape_cast %74 : vector<16xf32> to vector<16x1xf32>
    %cst_24 = arith.constant 1.000000e-24 : f32
    %76 = vector.broadcast %cst_24 : f32 to vector<16x1xf32>
    %77 = arith.maximumf %75, %76 : vector<16x1xf32>
    %78 = math.rsqrt %77 : vector<16x1xf32>
    %79 = vector.broadcast %78 : vector<16x1xf32> to vector<16x64xf32>
    %80 = arith.mulf %40, %79 : vector<16x64xf32>
    %81 = vector.extract_strided_slice %72 {offsets = [0, 0], sizes = [8, 64], strides = [1, 1]} : vector<16x64xf32> to vector<8x64xf32>
    %82 = vector.extract_strided_slice %72 {offsets = [0, 0], sizes = [8, 64], strides = [1, 1]} : vector<16x64xf32> to vector<8x64xf32>
    %83 = tpu.concatenate %81, %82 in 0 : vector<8x64xf32>, vector<8x64xf32> -> vector<16x64xf32>
    %84 = vector.extract_strided_slice %80 {offsets = [0, 0], sizes = [8, 64], strides = [1, 1]} : vector<16x64xf32> to vector<8x64xf32>
    %85 = vector.extract_strided_slice %80 {offsets = [0, 0], sizes = [8, 64], strides = [1, 1]} : vector<16x64xf32> to vector<8x64xf32>
    %86 = tpu.concatenate %84, %85 in 0 : vector<8x64xf32>, vector<8x64xf32> -> vector<16x64xf32>
    %c0_25 = arith.constant 0 : index
    %c0_26 = arith.constant 0 : index
    %87 = vector.load %arg5[%c0_25, %c0_26] : memref<64x64xf32, #tpu.memory_space<vmem>>, vector<64x64xf32>
    %cst_27 = arith.constant dense<0.000000e+00> : vector<16x64xf32>
    %88 = tpu.matmul %56, %87, %cst_27 {dimension_numbers = #tpu.dot_dimension_numbers<[1], [0], [0], [1], [0, 0, 1, 1], [], []>} : vector<16x64xf32>, vector<64x64xf32>, vector<16x64xf32> -> vector<16x64xf32>
    %89 = arith.mulf %88, %83 : vector<16x64xf32>
    %cst_28 = arith.constant dense<0.000000e+00> : vector<16xf32>
    %90 = vector.multi_reduction <add>, %89, %cst_28 [1] : vector<16x64xf32> to vector<16xf32>
    %91 = vector.shape_cast %90 : vector<16xf32> to vector<16x1xf32>
    %92 = vector.broadcast %1 : f32 to vector<16x1xf32>
    %93 = arith.addf %91, %92 : vector<16x1xf32>
    %c0_29 = arith.constant 0 : index
    %c0_30 = arith.constant 0 : index
    %94 = vector.load %arg7[%c0_29, %c0_30] : memref<16x1xf32, #tpu.memory_space<vmem>>, vector<16x1xf32>
    tpu.vector_store %arg7[%c0_29, %c0_30], %93 {strides = array<i32>} : memref<16x1xf32, #tpu.memory_space<vmem>>, vector<16x1xf32>,
    %c0_31 = arith.constant 0 : index
    %c0_32 = arith.constant 0 : index
    %95 = vector.load %arg6[%c0_31, %c0_32] : memref<64x64xf32, #tpu.memory_space<vmem>>, vector<64x64xf32>
    %cst_33 = arith.constant dense<0.000000e+00> : vector<16x64xf32>
    %96 = tpu.matmul %64, %95, %cst_33 {dimension_numbers = #tpu.dot_dimension_numbers<[1], [0], [0], [1], [0, 0, 1, 1], [], []>} : vector<16x64xf32>, vector<64x64xf32>, vector<16x64xf32> -> vector<16x64xf32>
    %97 = arith.mulf %96, %86 : vector<16x64xf32>
    %cst_34 = arith.constant dense<0.000000e+00> : vector<16xf32>
    %98 = vector.multi_reduction <add>, %97, %cst_34 [1] : vector<16x64xf32> to vector<16xf32>
    %99 = vector.shape_cast %98 : vector<16xf32> to vector<16x1xf32>
    %100 = vector.broadcast %2 : f32 to vector<16x1xf32>
    %101 = arith.addf %99, %100 : vector<16x1xf32>
    %c0_35 = arith.constant 0 : index
    %c0_36 = arith.constant 0 : index
    %102 = vector.load %arg8[%c0_35, %c0_36] : memref<16x1xf32, #tpu.memory_space<vmem>>, vector<16x1xf32>
    tpu.vector_store %arg8[%c0_35, %c0_36], %101 {strides = array<i32>} : memref<16x1xf32, #tpu.memory_space<vmem>>, vector<16x1xf32>,
    return
  }
}

</mosaic_0001>

<bundles_post_ra>
// kernel: ane_model_forward.1
= control target key start
LH: loop header
LB: loop body
LE: loop exit
PB: predicated region body
PF: predicated region fallthrough
CT: control target
= control target key end

     0   :  { %14 = vsyncpa [#allocation3], 0  ;;  %s1735_s30 = smov [#allocation2]   ;;  %s2919_s0 = inlined_call_operand.vmem [shape: f32[3], index: 0, kind: input, shape index: {}]   ;;  %s2920_s1 = inlined_call_operand.vmem [shape: f32[16,8,32], index: 1, kind: input, shape index: {}]   ;;  %s2921_s2 = inlined_call_operand.vmem [shape: f32[16,8,8], index: 2, kind: input, shape index: {}]   ;;  %s2922_s3 = inlined_call_operand.vmem [shape: f32[32,128], index: 3, kind: input, shape index: {}]   ;;  %s2923_s4 = inlined_call_operand.vmem [shape: f32[1,128], index: 4, kind: input, shape index: {}]   ;;  %s2924_s5 = inlined_call_operand.vmem [shape: f32[64,64], index: 5, kind: input, shape index: {}]   ;;  %s2925_s6 = inlined_call_operand.vmem [shape: f32[64,64], index: 6, kind: input, shape index: {}]   ;;  %s2926_s7 = inlined_call_operand.vmem [shape: f32[16,1], index: 7, kind: output, shape index: {0}]   ;;  %s2927_s8 = inlined_call_operand.vmem [shape: f32[16,1], index: 8, kind: output, shape index: {1}]  }
   0x1   :  { %s20_s29 = sshll.u32 %s2919_s0, 4  ;;  %s21_s29 = int_to_ptr.vmem [resolvable:$true] %s20_s29 }
   0x2   :  { %23 = dma.vmem_to_smem %s21_s29, 16, %s1735_s30, [#allocation3]  }
   0x3   :  { %1733 = dma.done.wait [#allocation3], 16  }
   0x4   :  { %1734 = vsyncadd [#allocation3], 4294967280 }
   0x5   :  { %40 = sfence }
   0x6   :  { %v1788_v0 = vld [vmem:[%s2921_s2 + $0x28] sm:$0xff]  ;;  %vm100_vm0 = vcmask 64512   ;;  %v1793_v1 = vld [vmem:[%s2921_s2 + $0x20] sm:$0xff]  ;;  %v1814_v7 = vld [vmem:[%s2921_s2 + $0x10] sm:$0xff]  ;;  %v81_v34 = vlaneseq  ;;  %vm742_vm4 = vcmask 1041409   ;;  %vm2928_vm8 = vcmask 1042434  }
   0x7   :  { %v1798_v2 = vld [vmem:[%s2921_s2] sm:$0xff]  ;;  %v116_v3 = vsel %vm100_vm0, %v1788_v0, 0.0  ;;  %v113_v4 = vsel %vm100_vm0, %v1793_v1, 0.0  ;;  %v1819_v8 = vld [vmem:[%s2921_s2 + $0x8] sm:$0xff]  ;;  %v107_v10 = vsel %vm100_vm0, %v1814_v7, 0.0  ;;  %v1835_v13 = vld [vmem:[%s2921_s2 + $0x30] sm:$0xff] }
   0x8   :  { %v101_v5 = vsel %vm100_vm0, %v1798_v2, 0.0  ;;  %117 = vadd.xlane.f32.xlu2 %v116_v3  ;;  %114 = vadd.xlane.f32.xlu1 %v113_v4  ;;  %v1809_v6 = vld [vmem:[%s2921_s2 + $0x40] sm:$0xff]  ;;  %v104_v11 = vsel %vm100_vm0, %v1819_v8, 0.0  ;;  %v1830_v12 = vld [vmem:[%s2921_s2 + $0x48] sm:$0xff]  ;;  %v1840_v14 = vld [vmem:[%s2921_s2 + $0x18] sm:$0xff]  ;;  %v119_v16 = vsel %vm100_vm0, %v1835_v13, 0.0 }
   0x9   :  { %102 = vadd.xlane.f32.xlu0 %v101_v5  ;;  %v125_v9 = vsel %vm100_vm0, %v1809_v6, 0.0  ;;  %v128_v15 = vsel %vm100_vm0, %v1830_v12, 0.0  ;;  %v110_v17 = vsel %vm100_vm0, %v1840_v14, 0.0  ;;  %v1851_v18 = vld [vmem:[%s2921_s2 + $0x50] sm:$0xff]  ;;  %v1856_v19 = vld [vmem:[%s2921_s2 + $0x38] sm:$0xff]  ;;  %v1861_v20 = vld [vmem:[%s2921_s2 + $0x60] sm:$0xff] }
   0xa   :  { %v131_v21 = vsel %vm100_vm0, %v1851_v18, 0.0  ;;  %v122_v22 = vsel %vm100_vm0, %v1856_v19, 0.0  ;;  %v137_v23 = vsel %vm100_vm0, %v1861_v20, 0.0  ;;  %v1872_v24 = vld [vmem:[%s2921_s2 + $0x70] sm:$0xff]  ;;  %v1877_v25 = vld [vmem:[%s2921_s2 + $0x58] sm:$0xff]  ;;  %v1882_v26 = vld [vmem:[%s2921_s2 + $0x68] sm:$0xff] }
   0xb   :  { %v143_v27 = vsel %vm100_vm0, %v1872_v24, 0.0  ;;  %v134_v28 = vsel %vm100_vm0, %v1877_v25, 0.0  ;;  %v140_v29 = vsel %vm100_vm0, %v1882_v26, 0.0  ;;  %v1893_v30 = vld [vmem:[%s2921_s2 + $0x78] sm:$0xff]  ;;  %v1905_v39 = vshrl.u32 %v81_v34, 7  ;;  %v44_v42 = vld [vmem:[%s2920_s1] sm:$0xff] }
   0xc   :  { %v146_v31 = vsel %vm100_vm0, %v1893_v30, 0.0  ;;  %v48_v43 = vld [vmem:[%s2920_s1 + $0x20] sm:$0xff]  ;;  %v45_v48 = vld [vmem:[%s2920_s1 + $0x8] sm:$0xff]  ;;  %v46_v49 = vld [vmem:[%s2920_s1 + $0x10] sm:$0xff]  ;;  %s1616_s26 = sld [smem:[#allocation2 + $0x1]] }
   0xd   :  { %vm83_vm1 = vcmp.eq.s32.totalorder %v1905_v39, 0  ;;  %v1936_v53 = vld [vmem:[%s2920_s1 + $0x40] sm:$0xff]  ;;  %v1965_v61 = vld [vmem:[%s2920_s1 + $0x18] sm:$0xff]  ;;  %v741_v5 = vrot.slane %v45_v48, 7  ;;  %s1617_s29 = sld [smem:[#allocation2 + $0x2]] }
   0xe   :  { %v1945_v56 = vsel %vm83_vm1, 0.0, %v44_v42  ;;  %v1949_v57 = vsel %vm83_vm1, 0.0, %v48_v43  ;;  %v1956_v59 = vsel %vm83_vm1, 0.0, %v45_v48  ;;  %v1960_v60 = vsel %vm83_vm1, 0.0, %v46_v49  ;;  %v2013_v43 = vld [vmem:[%s2920_s1 + $0x48] sm:$0xff]  ;;  %v76_v39 = vld [vmem:[%s2922_s3] sm:$0xff] }
   0xf   :  { %v1973_v63 = vsel %vm83_vm1, 0.0, %v1936_v53 }
  0x10   :  { %126 = vadd.xlane.f32.xlu2 %v125_v9  ;;  %108 = vadd.xlane.f32.xlu1 %v107_v10  ;;  %v744_v10 = vrot.slane %v46_v49, 6  ;;  %v762_v49 = vrot.slane %v2013_v43, 7 }
  0x11   :  { %105 = vadd.xlane.f32.xlu0 %v104_v11  ;;  %v1981_v11 = vsel %vm83_vm1, 0.0, %v1965_v61 }
  0x18   :  { %129 = vadd.xlane.f32.xlu2 %v128_v15  ;;  %120 = vadd.xlane.f32.xlu1 %v119_v16 }
  0x19   :  { %111 = vadd.xlane.f32.xlu0 %v110_v17 }
  0x20   :  { %132 = vadd.xlane.f32.xlu2 %v131_v21  ;;  %123 = vadd.xlane.f32.xlu1 %v122_v22  ;;  %v743_v21 = vsel %vm742_vm4, %v741_v5, %v44_v42 }
  0x21   :  { %138 = vadd.xlane.f32.xlu0 %v137_v23 }
  0x28   :  { %144 = vadd.xlane.f32.xlu2 %v143_v27  ;;  %135 = vadd.xlane.f32.xlu1 %v134_v28 }
  0x29   :  { %141 = vadd.xlane.f32.xlu0 %v140_v29 }
  0x31   :  { %147 = vadd.xlane.f32.xlu0 %v146_v31  ;;  %v1994_v31 = vsel %vm2928_vm8, %v744_v10, %v743_v21 }
  0x7b   :  { %v118_v32 = vpop.xlane.xlu2 %117  ;;  %v115_v33 = vpop.xlane.xlu1 %114 }
  0x7c   :  { %v1897_v35 = vmax.f32 %v118_v32, 1.0  ;;  %v1899_v36 = vmax.f32 %v115_v33, 1.0  ;;  %v103_v37 = vpop.xlane.xlu0 %102 }
  0x7d   :  { %v1901_v38 = vmax.f32 %v103_v37, 1.0 }
  0x7e   :  { %1671 = vrsqrt.f32 %v1897_v35  ;;  %vm211_vm2 = vweird.f32 %v1899_v36  ;;  %vm221_vm5 = vweird.f32 %v1897_v35 }
  0x7f   :  { %1673 = vrsqrt.f32 %v1899_v36  ;;  %vm171_vm3 = vweird.f32 %v1901_v38 }
  0x80   :  { %1675 = vrsqrt.f32 %v1901_v38 }
  0x83   :  { %v127_v40 = vpop.xlane.xlu2 %126  ;;  %v109_v41 = vpop.xlane.xlu1 %108 }
  0x84   :  { %v1915_v44 = vpop.eup %1671  ;;  %v1917_v45 = vmax.f32 %v127_v40, 1.0  ;;  %v1919_v46 = vmax.f32 %v109_v41, 1.0  ;;  %v106_v47 = vpop.xlane.xlu0 %105 }
  0x85   :  { %v1927_v50 = vpop.eup %1673  ;;  %v216_v51 = vmul.f32 %v1915_v44, %v1897_v35  ;;  %v1931_v52 = vmax.f32 %v106_v47, 1.0  ;;  %vm222_vm6 = vweird.f32 %v1915_v44 }
  0x86   :  { %v1938_v54 = vpop.eup %1675  ;;  %v206_v55 = vmul.f32 %v1927_v50, %v1899_v36  ;;  %1677 = vrsqrt.f32 %v1917_v45  ;;  %vm212_vm7 = vweird.f32 %v1927_v50  ;;  %vm251_vm9 = vweird.f32 %v1917_v45 }
  0x87   :  { %v166_v58 = vmul.f32 %v1938_v54, %v1901_v38  ;;  %1679 = vrsqrt.f32 %v1919_v46  ;;  %v217_v3 = vmul.f32 %v1915_v44, %v216_v51  ;;  %vm181_vm10 = vweird.f32 %v1931_v52  ;;  %vm213_vm13 = vmor %vm211_vm2, %vm212_vm7 }
  0x88   :  { %v207_v62 = vmul.f32 %v1927_v50, %v206_v55  ;;  %1681 = vrsqrt.f32 %v1931_v52  ;;  %vm172_vm11 = vweird.f32 %v1938_v54  ;;  %vm191_vm12 = vweird.f32 %v1919_v46 }
  0x89   :  { %v167_v4 = vmul.f32 %v1938_v54, %v166_v58  ;;  %v218_v33 = vmul.f32 0.5, %v217_v3  ;;  %vm173_vm14 = vmor %vm171_vm3, %vm172_vm11 }
  0x8a   :  { %v208_v9 = vmul.f32 0.5, %v207_v62  ;;  %v2032_v62 = vld [vmem:[%s2920_s1 + $0x50] sm:$0xff]  ;;  %vm2073_vm3 = vmor %vm221_vm5, %vm222_vm6 }
  0x8b   :  { %v168_v15 = vmul.f32 0.5, %v167_v4  ;;  %v130_v16 = vpop.xlane.xlu2 %129  ;;  %v121_v17 = vpop.xlane.xlu1 %120  ;;  %v219_v3 = vsub.f32 1.5, %v218_v33 }
  0x8c   :  { %v1987_v22 = vpop.eup %1677  ;;  %v1989_v23 = vmax.f32 %v130_v16, 1.0  ;;  %v1991_v27 = vmax.f32 %v121_v17, 1.0  ;;  %v112_v28 = vpop.xlane.xlu0 %111  ;;  %v209_v29 = vsub.f32 1.5, %v208_v9  ;;  %v764_v9 = vrot.slane %v2032_v62, 6 }
  0x8d   :  { %v1996_v32 = vpop.eup %1679  ;;  %v246_v34 = vmul.f32 %v1987_v22, %v1917_v45  ;;  %v2000_v37 = vmax.f32 %v112_v28, 1.0  ;;  %v169_v40 = vsub.f32 1.5, %v168_v15  ;;  %vm252_vm7 = vweird.f32 %v1987_v22 }
  0x8e   :  { %v2002_v41 = vpop.eup %1681  ;;  %v186_v42 = vmul.f32 %v1996_v32, %v1919_v46  ;;  %1683 = vrsqrt.f32 %v1989_v23  ;;  %v210_v58 = vmul.f32 %v1927_v50, %v209_v29  ;;  %vm192_vm2 = vweird.f32 %v1996_v32 }
  0x8f   :  { %v247_v47 = vmul.f32 %v1987_v22, %v246_v34  ;;  %v176_v48 = vmul.f32 %v2002_v41, %v1931_v52  ;;  %1685 = vrsqrt.f32 %v1991_v27  ;;  %v170_v55 = vmul.f32 %v1938_v54, %v169_v40  ;;  %vm193_vm11 = vmor %vm191_vm12, %vm192_vm2 }
  0x90   :  { %v187_v51 = vmul.f32 %v1996_v32, %v186_v42  ;;  %1687 = vrsqrt.f32 %v2000_v37  ;;  %v2044_v15 = vsel %vm213_vm13, %v1927_v50, %v210_v58  ;;  %vm182_vm15 = vweird.f32 %v2002_v41 }
  0x91   :  { %v248_v4 = vmul.f32 0.5, %v247_v47  ;;  %v177_v5 = vmul.f32 %v2002_v41, %v176_v48  ;;  %v2041_v36 = vsel %vm173_vm14, %v1938_v54, %v170_v55  ;;  %v329_v21 = vmul.f32 %v2044_v15, %v1949_v57  ;;  %vm183_vm6 = vmor %vm181_vm10, %vm182_vm15 }
  0x92   :  { %v188_v10 = vmul.f32 0.5, %v187_v51  ;;  %v325_v17 = vmul.f32 %v2041_v36, %v1945_v56  ;;  %v763_v40 = vsel %vm742_vm4, %v762_v49, %v1936_v53  ;;  %v220_v55 = vmul.f32 %v1915_v44, %v219_v3  ;;  %vm253_vm10 = vmor %vm251_vm9, %vm252_vm7 }
  0x93   :  { %v178_v16 = vmul.f32 0.5, %v177_v5  ;;  %v133_v38 = vpop.xlane.xlu2 %132  ;;  %v124_v28 = vpop.xlane.xlu1 %123  ;;  %v249_v56 = vsub.f32 1.5, %v248_v4  ;;  %451 = vmatpush.msra.mxu0 %v329_v21  ;;  %vm261_vm5 = vweird.f32 %v1989_v23  ;;  %v2107_v52 = vsel %vm2928_vm8, %v764_v9, %v763_v40 }
  0x94   :  { %v2052_v29 = vpop.eup %1683  ;;  %v2054_v54 = vmax.f32 %v133_v38, 1.0  ;;  %v2056_v33 = vmax.f32 %v124_v28, 1.0  ;;  %v139_v50 = vpop.xlane.xlu0 %138  ;;  %v189_v34 = vsub.f32 1.5, %v188_v10  ;;  %359 = vmatpush.msra.mxu1 %v325_v17  ;;  %1622 = vmatmul.msk.f32.vlgmr.msra.gmra.mxu0 %vm100_vm0, %v1793_v1  ;;  %vm201_vm14 = vweird.f32 %v2000_v37 }
  0x95   :  { %v2060_v42 = vpop.eup %1685  ;;  %v179_v47 = vsub.f32 1.5, %v178_v16  ;;  %v256_v57 = vmul.f32 %v2052_v29, %v1989_v23  ;;  %v2064_v48 = vmax.f32 %v139_v50, 1.0  ;;  %1618 = vmatmul.msk.f32.vlgmr.msra.gmra.mxu1 %vm100_vm0, %v1798_v2  ;;  %v250_v10 = vmul.f32 %v1987_v22, %v249_v56 }
  0x96   :  { %v2066_v51 = vpop.eup %1687  ;;  %v226_v49 = vmul.f32 %v2060_v42, %v1991_v27  ;;  %1689 = vrsqrt.f32 %v2054_v54  ;;  %v190_v3 = vmul.f32 %v1996_v32, %v189_v34  ;;  %v2112_v16 = vsel %vm2073_vm3, %v1915_v44, %v220_v55 }
  0x97   :  { %v257_v58 = vmul.f32 %v2052_v29, %v256_v57  ;;  %v196_v35 = vmul.f32 %v2066_v51, %v2000_v37  ;;  %1691 = vrsqrt.f32 %v2056_v33  ;;  %v180_v1 = vmul.f32 %v2002_v41, %v179_v47 }
  0x98   :  { %v227_v2 = vmul.f32 %v2060_v42, %v226_v49  ;;  %1693 = vrsqrt.f32 %v2064_v48  ;;  %v2120_v21 = vsel %vm193_vm11, %v1996_v32, %v190_v3  ;;  %vm262_vm12 = vweird.f32 %v2052_v29 }
  0x99   :  { %v258_v4 = vmul.f32 0.5, %v257_v58  ;;  %v197_v5 = vmul.f32 %v2066_v51, %v196_v35  ;;  %v2117_v46 = vsel %vm183_vm6, %v2002_v41, %v180_v1  ;;  %v327_v9 = vmul.f32 %v2120_v21, %v1960_v60  ;;  %v2170_v35 = vld [vmem:[%s2920_s1 + $0x28] sm:$0xff]  ;;  %vm2179_vm7 = vmor %vm261_vm5, %vm262_vm12 }
  0x9a   :  { %v2114_v17 = vmul.f32 0.5, %v227_v2  ;;  %v326_v45 = vmul.f32 %v2117_v46, %v1956_v59  ;;  %v2130_v41 = vsel %vm253_vm10, %v1987_v22, %v250_v10  ;;  %vm271_vm9 = vweird.f32 %v2054_v54 }
  0x9b   :  { %v259_v38 = vsub.f32 1.5, %v258_v4  ;;  %v145_v28 = vpop.xlane.xlu2 %144  ;;  %v136_v44 = vpop.xlane.xlu1 %135  ;;  %v198_v34 = vmul.f32 0.5, %v197_v5  ;;  %vm291_vm13 = vweird.f32 %v2064_v48  ;;  %405 = vmatpush.msra.mxu2 %v327_v9  ;;  %v333_v60 = vmul.f32 %v2130_v41, %v1973_v63 }
  0x9c   :  { %v2127_v50 = vpop.eup %1689  ;;  %v2132_v40 = vmax.f32 %v145_v28, 1.0  ;;  %v2134_v32 = vmax.f32 %v136_v44, 1.0  ;;  %v142_v56 = vpop.xlane.xlu0 %141  ;;  %382 = vmatpush.msrb.mxu1 %v326_v45  ;;  %v229_v57 = vsub.f32 1.5, %v2114_v17  ;;  %1620 = vmatmul.msk.f32.vlgmr.msra.gmra.mxu2 %vm100_vm0, %v1814_v7  ;;  %vm231_vm15 = vweird.f32 %v1991_v27 }
  0x9d   :  { %v2136_v47 = vpop.eup %1691  ;;  %v266_v59 = vmul.f32 %v2127_v50, %v2054_v54  ;;  %1619 = vmatmul.msk.f32.vlgmr.msrb.gmra.mxu1 %vm100_vm0, %v1819_v8  ;;  %v260_v53 = vmul.f32 %v2052_v29, %v259_v38  ;;  %vm272_vm2 = vweird.f32 %v2127_v50  ;;  %543 = vmatpush.msrb.mxu0 %v333_v60  ;;  %v2163_v8 = vmax.f32 %v142_v56, 1.0 }
  0x9e   :  { %v2144_v22 = vpop.eup %1693  ;;  %v236_v55 = vmul.f32 %v2136_v47, %v2056_v33  ;;  %1695 = vrsqrt.f32 %v2132_v40  ;;  %1626 = vmatmul.msk.f32.vlgmr.msrb.gmra.mxu0 %vm100_vm0, %v1809_v6  ;;  %v199_v7 = vsub.f32 1.5, %v198_v34  ;;  %vm202_vm3 = vweird.f32 %v2066_v51  ;;  %v2210_v34 = vld [vmem:[%s2920_s1 + $0x30] sm:$0xff] }
  0x9f   :  { %v267_v63 = vmul.f32 %v2127_v50, %v266_v59  ;;  %v286_v49 = vmul.f32 %v2144_v22, %v2064_v48  ;;  %1697 = vrsqrt.f32 %v2134_v32  ;;  %v747_v3 = vrot.slane %v1965_v61, 5  ;;  %vm203_vm10 = vmor %vm201_vm14, %vm202_vm3 }
  0xa0   :  { %v237_v58 = vmul.f32 %v2136_v47, %v236_v55  ;;  %vm241_vm6 = vweird.f32 %v2056_v33  ;;  %vm311_vm11 = vweird.f32 %v2132_v40  ;;  %1699 = vrsqrt.f32 %v2163_v8  ;;  %vm2223_vm14 = vmor %vm271_vm9, %vm272_vm2 }
  0xa1   :  { %v268_v2 = vmul.f32 0.5, %v267_v63  ;;  %v287_v1 = vmul.f32 %v2144_v22, %v286_v49  ;;  %v200_v5 = vmul.f32 %v2066_v51, %v199_v7  ;;  %vm748_vm8 = vcmask 1043459  }
  0xa2   :  { %v238_v6 = vmul.f32 0.5, %v237_v58  ;;  %v89_v61 = vsel %vm83_vm1, 0.0, %v2170_v35  ;;  %vm292_vm5 = vweird.f32 %v2144_v22  ;;  %v2200_v45 = vsel %vm748_vm8, %v747_v3, %v1994_v31 }
  0xa3   :  { %v269_v10 = vsub.f32 1.5, %v268_v2  ;;  %v288_v17 = vmul.f32 0.5, %v287_v1  ;;  %v2196_v38 = vsel %vm203_vm10, %v2066_v51, %v200_v5  ;;  %v330_v9 = vmul.f32 %v2112_v16, %v89_v61  ;;  %v2267_v1 = vld [vmem:[%s2920_s1 + $0x38] sm:$0xff] }
  0xa4   :  { %v2192_v23 = vpop.eup %1695  ;;  %vm281_vm12 = vweird.f32 %v2134_v32  ;;  %v148_v51 = vpop.xlane.xlu0 %147  ;;  %v2217_v31 = vsel %vm2179_vm7, %v2052_v29, %v260_v53  ;;  %v239_v60 = vsub.f32 1.5, %v238_v6  ;;  %vm301_vm3 = vweird.f32 %v2163_v8  ;;  %vm2235_vm7 = vmor %vm291_vm13, %vm292_vm5 }
  0xa5   :  { %v270_v37 = vmul.f32 %v2127_v50, %v269_v10  ;;  %v289_v28 = vsub.f32 1.5, %v288_v17  ;;  %v306_v44 = vmul.f32 %v2192_v23, %v2132_v40  ;;  %v2212_v56 = vpop.eup %1697  ;;  %v328_v55 = vmul.f32 %v2196_v38, %v1981_v11  ;;  %474 = vmatpush.msra.mxu1 %v330_v9 }
  0xa6   :  { %v276_v53 = vmul.f32 %v2212_v56, %v2134_v32  ;;  %v230_v49 = vmul.f32 %v2060_v42, %v229_v57  ;;  %1623 = vmatmul.msk.f32.vlgmr.msra.gmra.mxu1 %vm100_vm0, %v1788_v0  ;;  %v2245_v11 = vpop.eup %1699  ;;  %vm312_vm9 = vweird.f32 %v2192_v23  ;;  %v90_v48 = vsel %vm83_vm1, 0.0, %v2210_v34 }
  0xa7   :  { %v290_v63 = vmul.f32 %v2144_v22, %v289_v28  ;;  %v307_v54 = vmul.f32 %v2192_v23, %v306_v44  ;;  %428 = vmatpush.msra.mxu3 %v328_v55  ;;  %vm232_vm13 = vweird.f32 %v2060_v42  ;;  %v2252_v58 = vmax.f32 %v148_v51, 1.0 }
  0xa8   :  { %v2257_v57 = vsel %vm2223_vm14, %v2127_v50, %v270_v37  ;;  %v277_v0 = vmul.f32 %v2212_v56, %v276_v53  ;;  %v296_v2 = vmul.f32 %v2245_v11, %v2163_v8  ;;  %1621 = vmatmul.msk.f32.vlgmr.msra.gmra.mxu3 %vm100_vm0, %v1840_v14  ;;  %vm282_vm2 = vweird.f32 %v2212_v56  ;;  %vm233_vm5 = vmor %vm231_vm15, %vm232_vm13  ;;  %v55_v37 = vld [vmem:[%s2920_s1 + $0x58] sm:$0xff] }
  0xa9   :  { %v308_v7 = vmul.f32 0.5, %v307_v54  ;;  %v2272_v3 = vsel %vm2235_vm7, %v2144_v22, %v290_v63  ;;  %vm302_vm10 = vweird.f32 %v2245_v11  ;;  %1701 = vrsqrt.f32 %v2252_v58  ;;  %v56_v22 = vld [vmem:[%s2920_s1 + $0x60] sm:$0xff]  ;;  %vm2290_vm14 = vmor %vm311_vm11, %vm312_vm9 }
  0xaa   :  { %v278_v50 = vmul.f32 0.5, %v277_v0  ;;  %v297_v4 = vmul.f32 %v2245_v11, %v296_v2  ;;  %v2281_v6 = vsel %vm233_vm5, %v2060_v42, %v230_v49  ;;  %v91_v10 = vsel %vm83_vm1, 0.0, %v2267_v1  ;;  %vm2313_vm7 = vmor %vm281_vm12, %vm282_vm2 }
  0xab   :  { %v309_v14 = vsub.f32 1.5, %v308_v7  ;;  %v331_v5 = vmul.f32 %v2281_v6, %v90_v48  ;;  %v240_v42 = vmul.f32 %v2136_v47, %v239_v60  ;;  %vm242_vm15 = vweird.f32 %v2136_v47  ;;  %v79_v48 = vld [vmem:[%s2922_s3 + $0x18] sm:$0xff] }
  0xac   :  { %v279_v61 = vsub.f32 1.5, %v278_v50  ;;  %v298_v9 = vmul.f32 0.5, %v297_v4  ;;  %vm243_vm11 = vmor %vm241_vm6, %vm242_vm15  ;;  %v93_v40 = vsel %vm83_vm1, 0.0, %v2013_v43  ;;  %v94_v43 = vsel %vm83_vm1, 0.0, %v2032_v62 }
  0xad   :  { %v310_v17 = vmul.f32 %v2192_v23, %v309_v14  ;;  %497 = vmatpush.msrb.mxu2 %v331_v5  ;;  %v2318_v33 = vsel %vm243_vm11, %v2136_v47, %v240_v42  ;;  %v334_v44 = vmul.f32 %v2217_v31, %v93_v40  ;;  %v96_v51 = vsel %vm83_vm1, 0.0, %v56_v22  ;;  %v57_v47 = vld [vmem:[%s2920_s1 + $0x68] sm:$0xff]  ;;  %vm2342_vm6 = vmor %vm301_vm3, %vm302_vm10 }
  0xae   :  { %v280_v59 = vmul.f32 %v2212_v56, %v279_v61  ;;  %v299_v32 = vsub.f32 1.5, %v298_v9  ;;  %1624 = vmatmul.msk.f32.vlgmr.msrb.gmra.mxu2 %vm100_vm0, %v1835_v13  ;;  %v332_v60 = vmul.f32 %v2318_v33, %v91_v10  ;;  %v335_v13 = vmul.f32 %v2257_v57, %v94_v43 }
  0xaf   :  { %v1702_v55 = vpop.eup %1701  ;;  %v2336_v62 = vsel %vm2290_vm14, %v2192_v23, %v310_v17  ;;  %566 = vmatpush.msrb.mxu1 %v334_v44  ;;  %v337_v29 = vmul.f32 %v2272_v3, %v96_v51  ;;  %v95_v54 = vsel %vm83_vm1, 0.0, %v55_v37  ;;  %v58_v23 = vld [vmem:[%s2920_s1 + $0x70] sm:$0xff]  ;;  %vm321_vm12 = vweird.f32 %v2252_v58 }
  0xb0   :  { %v2356_v8 = vsel %vm2313_vm7, %v2212_v56, %v280_v59  ;;  %v300_v53 = vmul.f32 %v2245_v11, %v299_v32  ;;  %v316_v49 = vmul.f32 %v1702_v55, %v2252_v58  ;;  %520 = vmatpush.msrb.mxu3 %v332_v60  ;;  %1627 = vmatmul.msk.f32.vlgmr.msrb.gmra.mxu1 %vm100_vm0, %v1830_v12  ;;  %v97_v56 = vsel %vm83_vm1, 0.0, %v57_v47 }
  0xb1   :  { %589 = vmatpush.msra.mxu2 %v335_v13  ;;  %635 = vmatpush.msra.mxu0 %v337_v29  ;;  %v336_v7 = vmul.f32 %v2356_v8, %v95_v54  ;;  %v98_v12 = vsel %vm83_vm1, 0.0, %v58_v23  ;;  %vm322_vm3 = vweird.f32 %v1702_v55  ;;  %vm954_vm10 = vcmask 523264  }
  0xb2   :  { %v2371_v0 = vsel %vm2342_vm6, %v2245_v11, %v300_v53  ;;  %v317_v2 = vmul.f32 %v1702_v55, %v316_v49  ;;  %1625 = vmatmul.msk.f32.vlgmr.msrb.gmra.mxu3 %vm100_vm0, %v1856_v19  ;;  %1630 = vmatmul.msk.f32.vlgmr.msra.gmra.mxu0 %vm100_vm0, %v1861_v20  ;;  %v339_v50 = vmul.f32 %v2336_v62, %v98_v12  ;;  %v78_v11 = vld [vmem:[%s2922_s3 + $0x10] sm:$0xff]  ;;  %v59_v19 = vld [vmem:[%s2920_s1 + $0x78] sm:$0xff]  ;;  %vm323_vm9 = vmor %vm321_vm12, %vm322_vm3 }
  0xb3   :  { %612 = vmatpush.msra.mxu3 %v336_v7  ;;  %v338_v14 = vmul.f32 %v2371_v0, %v97_v56  ;;  %844 = vmatpush.msrb.mxu0 %v79_v48  ;;  %v99_v58 = vsel %vm83_vm1, 0.0, %v59_v19  ;;  %vm779_vm1 = vcmask 261120  }
  0xb4   :  { %v318_v4 = vmul.f32 0.5, %v317_v2  ;;  %681 = vmatpush.msrb.mxu2 %v339_v50 }
  0xb5   :  { %658 = vmatpush.msra.mxu1 %v338_v14  ;;  %845 = vmatpush.msrb.mxu0 %v78_v11 }
  0xb6   :  { %v319_v20 = vsub.f32 1.5, %v318_v4  ;;  %1628 = vmatmul.msk.f32.vlgmr.msra.gmra.mxu2 %vm100_vm0, %v1851_v18 }
  0xb7   :  { %1657 = vmatpush.msra.mxu2 %v79_v48  ;;  %1656 = vmatpush.msrb.mxu1 %v79_v48 }
  0xb8   :  { %v320_v22 = vmul.f32 %v1702_v55, %v319_v20  ;;  %1631 = vmatmul.msk.f32.vlgmr.msra.gmra.mxu1 %vm100_vm0, %v1882_v26  ;;  %v77_v26 = vld [vmem:[%s2922_s3 + $0x8] sm:$0xff]  ;;  %s41_s3 = sld [smem:[#allocation2]] }
  0xb9   :  { %1660 = vmatpush.msra.mxu2 %v78_v11  ;;  %1659 = vmatpush.msrb.mxu1 %v78_v11 }
  0xba   :  { %v2394_v27 = vsel %vm323_vm9, %v1702_v55, %v320_v22  ;;  %1629 = vmatmul.msk.f32.vlgmr.msra.gmra.mxu3 %vm100_vm0, %v1877_v25  ;;  %846 = vmatpush.msrb.mxu0 %v77_v26 }
  0xbb   :  { %v340_v18 = vmul.f32 %v2394_v27, %v99_v58  ;;  %1663 = vmatpush.msra.mxu2 %v77_v26  ;;  %1662 = vmatpush.msrb.mxu1 %v77_v26 }
  0xbc   :  { %847 = vmatpush.msrb.mxu0 %v76_v39 }
  0xbd   :  { %704 = vmatpush.msrb.mxu3 %v340_v18  ;;  %1666 = vmatpush.msra.mxu2 %v76_v39 }
  0xbe   :  { %1632 = vmatmul.msk.f32.vlgmr.msrb.gmra.mxu2 %vm100_vm0, %v1872_v24  ;;  %1665 = vmatpush.msrb.mxu1 %v76_v39  ;;  %v2447_v49 = vstv %s41_s3 }
  0xbf   :  { %1658 = vmatpush.msra.mxu3 %v79_v48 }
  0xc1   :  { %1661 = vmatpush.msra.mxu3 %v78_v11 }
  0xc2   :  { %1633 = vmatmul.msk.f32.vlgmr.msrb.gmra.mxu3 %vm100_vm0, %v1893_v30 }
  0xc3   :  { %1664 = vmatpush.msra.mxu3 %v77_v26 }
  0xc5   :  { %1667 = vmatpush.msra.mxu3 %v76_v39 }
 0x111   :  { %v453_v25 = vpop.f32.mrf.mxu0 }
 0x112   :  { %v361_v24 = vpop.f32.mrf.mxu1 }
 0x113   :  { %v709_v30 = vmul.f32 %v361_v24, %v2041_v36 }
 0x115   :  { %1634 = vmatmul.msk.f32.vlgmr.msrb.gmra.mxu0 %vm779_vm1, %v709_v30 }
 0x11a   :  { %v384_v5 = vpop.f32.mrf.mxu1 }
 0x11b   :  { %v710_v10 = vmul.f32 %v384_v5, %v2117_v46  ;;  %v545_v42 = vpop.f32.mrf.mxu0 }
 0x11c   :  { %v717_v17 = vmul.f32 %v545_v42, %v2130_v41 }
 0x11d   :  { %1635 = vmatmul.msk.f32.gmra.mxu0 %vm779_vm1, %v710_v10 }
 0x11e   :  { %1642 = vmatmul.msk.f32.vlgmr.msra.gmra.mxu2 %vm779_vm1, %v717_v17 }
 0x11f   :  { %v407_v61 = vpop.f32.mrf.mxu2 }
 0x120   :  { %v711_v9 = vmul.f32 %v407_v61, %v2120_v21  ;;  %v713_v21 = vmul.f32 %v453_v25, %v2044_v15 }
 0x123   :  { %v476_v40 = vpop.f32.mrf.mxu1 }
 0x125   :  { %1636 = vmatmul.msk.f32.gmra.mxu0 %vm779_vm1, %v711_v9 }
 0x12b   :  { %v430_v37 = vpop.f32.mrf.mxu3 }
 0x12c   :  { %v712_v36 = vmul.f32 %v430_v37, %v2196_v38 }
 0x12d   :  { %v568_v28 = vpop.f32.mrf.mxu1 }
 0x12e   :  { %v718_v44 = vmul.f32 %v568_v28, %v2217_v31  ;;  %1637 = vmatmul.msk.f32.gmra.mxu0 %vm779_vm1, %v712_v36 }
 0x12f   :  { %v637_v46 = vpop.f32.mrf.mxu0 }
 0x130   :  { %v721_v41 = vmul.f32 %v637_v46, %v2272_v3  ;;  %1643 = vmatmul.msk.f32.gmra.mxu2 %vm779_vm1, %v718_v44 }
 0x131   :  { %v499_v43 = vpop.f32.mrf.mxu2 }
 0x132   :  { %v715_v51 = vmul.f32 %v499_v43, %v2281_v6  ;;  %1646 = vmatmul.msk.f32.vlgmr.msra.gmra.mxu3 %vm779_vm1, %v721_v41  ;;  %v714_v6 = vmul.f32 %v476_v40, %v2112_v16 }
 0x134   :  { %1640 = vmatmul.msk.f32.vlgmr.msrb.gmra.mxu1 %vm779_vm1, %v715_v51 }
 0x135   :  { %v522_v38 = vpop.f32.mrf.mxu3  ;;  %v660_v59 = vpop.f32.mrf.mxu1 }
 0x136   :  { %v722_v31 = vmul.f32 %v660_v59, %v2371_v0  ;;  %1638 = vmatmul.msk.f32.gmra.mxu0 %vm779_vm1, %v713_v21  ;;  %v716_v32 = vmul.f32 %v522_v38, %v2318_v33 }
 0x139   :  { %v591_v3 = vpop.f32.mrf.mxu2 }
 0x13a   :  { %v719_v60 = vmul.f32 %v591_v3, %v2257_v57  ;;  %1647 = vmatmul.msk.f32.gmra.mxu3 %vm779_vm1, %v722_v31 }
 0x13c   :  { %1641 = vmatmul.msk.f32.gmra.mxu1 %vm779_vm1, %v716_v32  ;;  %1644 = vmatmul.msk.f32.gmra.mxu2 %vm779_vm1, %v719_v60 }
 0x13d   :  { %v614_v15 = vpop.f32.mrf.mxu3 }
 0x13e   :  { %1639 = vmatmul.msk.f32.gmra.mxu0 %vm779_vm1, %v714_v6  ;;  %v720_v55 = vmul.f32 %v614_v15, %v2356_v8  ;;  %v2444_v8 = vld [vmem:[%s2923_s4] ss:$0 sm:$0xff]  ;;  %s1736_s4 = smov 64  }
 0x141   :  { %v683_v47 = vpop.f32.mrf.mxu2 }
 0x142   :  { %v723_v63 = vmul.f32 %v683_v47, %v2336_v62 }
 0x144   :  { %1645 = vmatmul.msk.f32.gmra.mxu2 %vm779_vm1, %v720_v55  ;;  %1648 = vmatmul.msk.f32.gmra.mxu3 %vm779_vm1, %v723_v63 }
 0x145   :  { %v706_v57 = vpop.f32.mrf.mxu3 }
 0x146   :  { %v724_v33 = vmul.f32 %v706_v57, %v2394_v27 }
 0x14c   :  { %1649 = vmatmul.msk.f32.gmra.mxu3 %vm779_vm1, %v724_v33 }
 0x192   :  { %v849_v16 = vpop.f32.mrf.mxu0 }
 0x193   :  { %v850_v2 = vadd.f32 %v2444_v8, %v849_v16 }
 0x195   :  { %v920_v19 = vmul.f32 %v2447_v49, %v850_v2  ;;  %vm902_vm2 = vcmp.ge.f32.partialorder %v850_v2, 0.0 }
 0x197   :  { %v2463_v18 = vsel %vm902_vm2, %v850_v2, %v920_v19  ;;  %vm2943_vm2 = vcmask 1042434  }
 0x198   :  { %v1237_v17 = vmul.f32 %v2463_v18, %v2463_v18 }
 0x19a   :  { %v852_v13 = vpop.f32.mrf.mxu0 }
 0x19b   :  { %v853_v53 = vadd.f32 %v2444_v8, %v852_v13 }
 0x19d   :  { %v921_v7 = vmul.f32 %v2447_v49, %v853_v53  ;;  %vm903_vm0 = vcmp.ge.f32.partialorder %v853_v53, 0.0 }
 0x19f   :  { %v2453_v14 = vsel %vm903_vm0, %v853_v53, %v921_v7 }
 0x1a0   :  { %v1238_v20 = vmul.f32 %v2453_v14, %v2453_v14 }
 0x1a1   :  { %v873_v54 = vpop.f32.mrf.mxu2 }
 0x1a2   :  { %v855_v29 = vpop.f32.mrf.mxu0  ;;  %v874_v48 = vadd.f32 %v2444_v8, %v873_v54  ;;  %v1269_v25 = vrot.slane %v1238_v20, 7 }
 0x1a3   :  { %v856_v50 = vadd.f32 %v2444_v8, %v855_v29 }
 0x1a4   :  { %v928_v12 = vmul.f32 %v2447_v49, %v874_v48  ;;  %vm910_vm13 = vcmp.ge.f32.partialorder %v874_v48, 0.0  ;;  %v1270_v28 = vsel %vm742_vm4, %v1269_v25, %v1237_v17 }
 0x1a5   :  { %v922_v58 = vmul.f32 %v2447_v49, %v856_v50  ;;  %vm904_vm5 = vcmp.ge.f32.partialorder %v856_v50, 0.0 }
 0x1a6   :  { %v2459_v22 = vsel %vm910_vm13, %v874_v48, %v928_v12  ;;  %vm751_vm13 = vcmask 1044484  }
 0x1a7   :  { %v1011_v26 = vsel %vm954_vm10, %v2459_v22, 0.0  ;;  %v2468_v5 = vsel %vm904_vm5, %v856_v50, %v922_v58  ;;  %v2483_v43 = vmul.f32 %v2459_v22, %v2459_v22 }
 0x1a8   :  { %v1012_v61 = vrot.slane %v1011_v26, 4  ;;  %v1239_v44 = vmul.f32 %v2468_v5, %v2468_v5 }
 0x1aa   :  { %v2489_v59 = vadd.f32 %v1012_v61, %v1011_v26  ;;  %v1271_v15 = vrot.slane %v1239_v44, 6 }
 0x1ab   :  { %v858_v23 = vpop.f32.mrf.mxu0 }
 0x1ac   :  { %v859_v27 = vadd.f32 %v2444_v8, %v858_v23  ;;  %v1272_v12 = vsel %vm2943_vm2, %v1271_v15, %v1270_v28 }
 0x1ae   :  { %v923_v10 = vmul.f32 %v2447_v49, %v859_v27  ;;  %vm905_vm14 = vcmp.ge.f32.partialorder %v859_v27, 0.0 }
 0x1b0   :  { %v2486_v21 = vsel %vm905_vm14, %v859_v27, %v923_v10  ;;  %vm754_vm14 = vcmask 1045509  }
 0x1b1   :  { %v867_v11 = vpop.f32.mrf.mxu1  ;;  %v1240_v47 = vmul.f32 %v2486_v21, %v2486_v21 }
 0x1b2   :  { %v868_v51 = vadd.f32 %v2444_v8, %v867_v11 }
 0x1b3   :  { %v876_v62 = vpop.f32.mrf.mxu2  ;;  %v861_v56 = vpop.f32.mrf.mxu0 }
 0x1b4   :  { %v877_v39 = vadd.f32 %v2444_v8, %v876_v62  ;;  %v862_v42 = vadd.f32 %v2444_v8, %v861_v56  ;;  %vm908_vm12 = vcmp.ge.f32.partialorder %v868_v51, 0.0  ;;  %v926_v63 = vmul.f32 %v2447_v49, %v868_v51 }
 0x1b5   :  { %v885_v0 = vpop.f32.mrf.mxu3  ;;  %v1273_v56 = vrot.slane %v1240_v47, 5 }
 0x1b6   :  { %v929_v37 = vmul.f32 %v2447_v49, %v877_v39  ;;  %vm911_vm15 = vcmp.ge.f32.partialorder %v877_v39, 0.0  ;;  %v886_v46 = vadd.f32 %v2444_v8, %v885_v0  ;;  %v924_v38 = vmul.f32 %v2447_v49, %v862_v42 }
 0x1b7   :  { %vm906_vm11 = vcmp.ge.f32.partialorder %v862_v42, 0.0  ;;  %v2524_v50 = vsel %vm908_vm12, %v868_v51, %v926_v63  ;;  %v1274_v28 = vsel %vm748_vm8, %v1273_v56, %v1272_v12  ;;  %vm2944_vm12 = vmmov %vm2943_vm2 }
 0x1b8   :  { %v2493_v3 = vsel %vm911_vm15, %v877_v39, %v929_v37  ;;  %v932_v55 = vmul.f32 %v2447_v49, %v886_v46  ;;  %vm914_vm3 = vcmp.ge.f32.partialorder %v886_v46, 0.0  ;;  %v2501_v57 = vsel %vm906_vm11, %v862_v42, %v924_v38 }
 0x1b9   :  { %v870_v40 = vpop.f32.mrf.mxu1  ;;  %v1018_v16 = vsel %vm954_vm10, %v2493_v3, 0.0  ;;  %v1246_v13 = vmul.f32 %v2493_v3, %v2493_v3  ;;  %v1241_v7 = vmul.f32 %v2501_v57, %v2501_v57  ;;  %v1243_v17 = vmul.f32 %v2524_v50, %v2524_v50 }
 0x1ba   :  { %v871_v31 = vadd.f32 %v2444_v8, %v870_v40  ;;  %v2514_v48 = vsel %vm914_vm3, %v886_v46, %v932_v55  ;;  %v1019_v11 = vrot.slane %v1018_v16, 4  ;;  %vm757_vm11 = vcmask 1046534   ;;  %vm2945_vm3 = vmmov %vm2943_vm2 }
 0x1bb   :  { %v864_v24 = vpop.f32.mrf.mxu0  ;;  %v1283_v58 = vrot.slane %v1246_v13, 7  ;;  %v1039_v27 = vsel %vm954_vm10, %v2514_v48, 0.0  ;;  %v1275_v39 = vrot.slane %v1241_v7, 4 }
 0x1bc   :  { %v865_v9 = vadd.f32 %v2444_v8, %v864_v24  ;;  %v927_v33 = vmul.f32 %v2447_v49, %v871_v31  ;;  %vm909_vm0 = vcmp.ge.f32.partialorder %v871_v31, 0.0  ;;  %v1020_v44 = vadd.f32 %v1019_v11, %v1018_v16 }
 0x1bd   :  { %v888_v30 = vpop.f32.mrf.mxu3  ;;  %v1040_v55 = vrot.slane %v1039_v27, 4  ;;  %v1284_v13 = vsel %vm742_vm4, %v1283_v58, %v2483_v43 }
 0x1be   :  { %v925_v32 = vmul.f32 %v2447_v49, %v865_v9  ;;  %vm907_vm7 = vcmp.ge.f32.partialorder %v865_v9, 0.0  ;;  %v889_v62 = vadd.f32 %v2444_v8, %v888_v30  ;;  %v2529_v20 = vsel %vm909_vm0, %v871_v31, %v927_v33 }
 0x1bf   :  { %v879_v4 = vpop.f32.mrf.mxu2  ;;  %v1249_v30 = vmul.f32 %v2514_v48, %v2514_v48  ;;  %v1244_v40 = vmul.f32 %v2529_v20, %v2529_v20  ;;  %v1021_v12 = vrot.slane %v1020_v44, 2 }
 0x1c0   :  { %v880_v36 = vadd.f32 %v2444_v8, %v879_v4  ;;  %v2508_v29 = vsel %vm907_vm7, %v865_v9, %v925_v32  ;;  %v933_v26 = vmul.f32 %v2447_v49, %v889_v62  ;;  %vm915_vm5 = vcmp.ge.f32.partialorder %v889_v62, 0.0 }
 0x1c1   :  { %v1242_v0 = vmul.f32 %v2508_v29, %v2508_v29  ;;  %vm760_vm7 = vcmask 1047559   ;;  %v1279_v32 = vrot.slane %v1243_v17, 2  ;;  %v1281_v47 = vrot.slane %v1244_v40, 1 }
 0x1c2   :  { %v930_v60 = vmul.f32 %v2447_v49, %v880_v36  ;;  %vm912_vm6 = vcmp.ge.f32.partialorder %v880_v36, 0.0  ;;  %v2547_v37 = vsel %vm915_vm5, %v889_v62, %v933_v26 }
 0x1c3   :  { %v1277_v42 = vrot.slane %v1242_v0, 3  ;;  %v1046_v62 = vsel %vm954_vm10, %v2547_v37, 0.0 }
 0x1c4   :  { %v2510_v23 = vsel %vm912_vm6, %v880_v36, %v930_v60  ;;  %v1250_v60 = vmul.f32 %v2547_v37, %v2547_v37 }
 0x1c5   :  { %v1025_v4 = vsel %vm954_vm10, %v2510_v23, 0.0  ;;  %v1247_v24 = vmul.f32 %v2510_v23, %v2510_v23 }
 0x1c6   :  { %v1026_v10 = vrot.slane %v1025_v4, 4  ;;  %v1291_v43 = vrot.slane %v1250_v60, 3 }
 0x1c7   :  { %v882_v41 = vpop.f32.mrf.mxu2  ;;  %v891_v54 = vpop.f32.mrf.mxu3  ;;  %v1285_v46 = vrot.slane %v1247_v24, 6 }
 0x1c8   :  { %v883_v6 = vadd.f32 %v2444_v8, %v882_v41  ;;  %v892_v19 = vadd.f32 %v2444_v8, %v891_v54  ;;  %v1276_v41 = vsel %vm751_vm13, %v1275_v39, %v1274_v28  ;;  %v1027_v38 = vadd.f32 %v1026_v10, %v1025_v4 }
 0x1c9   :  { %v1278_v31 = vsel %vm754_vm14, %v1277_v42, %v1276_v41  ;;  %v1289_v54 = vrot.slane %v1249_v30, 4  ;;  %v1286_v0 = vsel %vm2944_vm12, %v1285_v46, %v1284_v13  ;;  %v1041_v42 = vadd.f32 %v1040_v55, %v1039_v27 }
 0x1ca   :  { %vm913_vm9 = vcmp.ge.f32.partialorder %v883_v6, 0.0  ;;  %v931_v53 = vmul.f32 %v2447_v49, %v883_v6  ;;  %v934_v9 = vmul.f32 %v2447_v49, %v892_v19  ;;  %vm916_vm15 = vcmp.ge.f32.partialorder %v892_v19, 0.0 }
 0x1cb   :  { %v1280_v33 = vsel %vm757_vm11, %v1279_v32, %v1278_v31  ;;  %v1028_v11 = vrot.slane %v1027_v38, 2  ;;  %v1014_v41 = vrot.slane %v2489_v59, 2  ;;  %v1042_v60 = vrot.slane %v1041_v42, 2 }
 0x1cc   :  { %v2520_v2 = vsel %vm913_vm9, %v883_v6, %v931_v53  ;;  %v2554_v15 = vsel %vm916_vm15, %v892_v19, %v934_v9  ;;  %v1282_v53 = vsel %vm760_vm7, %v1281_v47, %v1280_v33  ;;  %v1047_v19 = vrot.slane %v1046_v62, 4  ;;  %vm2946_vm9 = vmmov %vm2943_vm2 }
 0x1cd   :  { %v1032_v25 = vsel %vm954_vm10, %v2520_v2, 0.0  ;;  %v1248_v61 = vmul.f32 %v2520_v2, %v2520_v2  ;;  %1297 = vrot.lane.b32.xlu1 %v1282_v53, %s1736_s4  ;;  %v1251_v56 = vmul.f32 %v2554_v15, %v2554_v15  ;;  %v1053_v24 = vsel %vm954_vm10, %v2554_v15, 0.0 }
 0x1ce   :  { %v1033_v36 = vrot.slane %v1032_v25, 4  ;;  %v1054_v28 = vrot.slane %v1053_v24, 4 }
 0x1cf   :  { %v894_v51 = vpop.f32.mrf.mxu3  ;;  %v1287_v6 = vrot.slane %v1248_v61, 5  ;;  %v1293_v17 = vrot.slane %v1251_v56, 2  ;;  %v1022_v61 = vadd.f32 %v1021_v12, %v1020_v44  ;;  %v1015_v44 = vadd.f32 %v1014_v41, %v2489_v59 }
 0x1d0   :  { %v1034_v63 = vadd.f32 %v1033_v36, %v1032_v25  ;;  %v895_v16 = vadd.f32 %v2444_v8, %v894_v51  ;;  %v1029_v36 = vadd.f32 %v1028_v11, %v1027_v38  ;;  %v1048_v51 = vadd.f32 %v1047_v19, %v1046_v62 }
 0x1d1   :  { %v1288_v4 = vsel %vm748_vm8, %v1287_v6, %v1286_v0  ;;  %v1023_v6 = vrot.slane %v1022_v61, 1  ;;  %v1055_v55 = vadd.f32 %v1054_v28, %v1053_v24  ;;  %v1016_v62 = vrot.slane %v1015_v44, 1 }
 0x1d2   :  { %vm917_vm6 = vcmp.ge.f32.partialorder %v895_v16, 0.0  ;;  %v935_v7 = vmul.f32 %v2447_v49, %v895_v16  ;;  %v1035_v58 = vrot.slane %v1034_v63, 2  ;;  %v1290_v39 = vsel %vm751_vm13, %v1289_v54, %v1288_v4 }
 0x1d3   :  { %v1292_v10 = vsel %vm754_vm14, %v1291_v43, %v1290_v39  ;;  %v1030_v27 = vrot.slane %v1029_v36, 1  ;;  %v1049_v33 = vrot.slane %v1048_v51, 2  ;;  %v1024_v13 = vadd.f32 %v1023_v6, %v1022_v61 }
 0x1d4   :  { %v2569_v26 = vsel %vm917_vm6, %v895_v16, %v935_v7  ;;  %v1294_v46 = vsel %vm757_vm11, %v1293_v17, %v1292_v10  ;;  %v1036_v31 = vadd.f32 %v1035_v58, %v1034_v63  ;;  %v1043_v16 = vadd.f32 %v1042_v60, %v1041_v42 }
 0x1d5   :  { %v1060_v25 = vsel %vm954_vm10, %v2569_v26, 0.0  ;;  %v1252_v30 = vmul.f32 %v2569_v26, %v2569_v26  ;;  %v1031_v53 = vadd.f32 %v1030_v27, %v1029_v36  ;;  %v1056_v7 = vrot.slane %v1055_v55, 2 }
 0x1d6   :  { %v1061_v9 = vrot.slane %v1060_v25, 4  ;;  %v1037_v38 = vrot.slane %v1036_v31, 1  ;;  %v1050_v63 = vadd.f32 %v1049_v33, %v1048_v51  ;;  %v1044_v0 = vrot.slane %v1043_v16, 1 }
 0x1d7   :  { %v1295_v40 = vrot.slane %v1252_v30, 1  ;;  %v1076_v12 = vsub.f32 %v1024_v13, %v2493_v3  ;;  %v1077_v43 = vsub.f32 %v1031_v53, %v2510_v23  ;;  %v1057_v4 = vadd.f32 %v1056_v7, %v1055_v55 }
 0x1d8   :  { %v1062_v47 = vadd.f32 %v1061_v9, %v1060_v25  ;;  %v1038_v56 = vadd.f32 %v1037_v38, %v1036_v31  ;;  %v1017_v19 = vadd.f32 %v1016_v62, %v1015_v44  ;;  %v1051_v58 = vrot.slane %v1050_v63, 1 }
 0x1d9   :  { %v1296_v32 = vsel %vm760_vm7, %v1295_v40, %v1294_v46  ;;  %v1045_v39 = vadd.f32 %v1044_v0, %v1043_v16  ;;  %v2587_v24 = vmul.f32 0.14285715, %v1076_v12  ;;  %v2589_v30 = vmul.f32 0.14285715, %v1077_v43 }
 0x1da   :  { %1299 = vrot.lane.b32.xlu2 %v1296_v32, %s1736_s4  ;;  %v1063_v54 = vrot.slane %v1062_v47, 2  ;;  %v1078_v59 = vsub.f32 %v1038_v56, %v2520_v2  ;;  %v1058_v10 = vrot.slane %v1057_v4, 1  ;;  %v1075_v42 = vsub.f32 %v1017_v19, %v2459_v22 }
 0x1db   :  { %v1052_v17 = vadd.f32 %v1051_v58, %v1050_v63  ;;  %v1079_v9 = vsub.f32 %v1045_v39, %v2514_v48  ;;  %v1108_v40 = vmul.f32 %v2587_v24, %v2587_v24  ;;  %v1109_v28 = vmul.f32 %v2589_v30, %v2589_v30 }
 0x1dc   :  { %v1064_v11 = vadd.f32 %v1063_v54, %v1062_v47  ;;  %v2592_v61 = vmul.f32 0.14285715, %v1078_v59  ;;  %v1059_v46 = vadd.f32 %v1058_v10, %v1057_v4  ;;  %v2599_v41 = vmul.f32 0.14285715, %v1075_v42 }
 0x1dd   :  { %v1080_v51 = vsub.f32 %v1052_v17, %v2547_v37  ;;  %v2604_v32 = vmul.f32 0.14285715, %v1079_v9  ;;  %v1145_v60 = vrot.slane %v1108_v40, 7  ;;  %v1147_v47 = vrot.slane %v1109_v28, 6 }
 0x1de   :  { %v1065_v25 = vrot.slane %v1064_v11, 1  ;;  %v1110_v31 = vmul.f32 %v2592_v61, %v2592_v61  ;;  %v1081_v27 = vsub.f32 %v1059_v46, %v2554_v15  ;;  %v1107_v55 = vmul.f32 %v2599_v41, %v2599_v41 }
 0x1df   :  { %v2610_v44 = vmul.f32 0.14285715, %v1080_v51  ;;  %v1111_v38 = vmul.f32 %v2604_v32, %v2604_v32  ;;  %v969_v10 = vsel %vm954_vm10, %v2468_v5, 0.0  ;;  %v976_v42 = vsel %vm954_vm10, %v2486_v21, 0.0 }
 0x1e0   :  { %v1066_v36 = vadd.f32 %v1065_v25, %v1064_v11  ;;  %v1149_v33 = vrot.slane %v1110_v31, 5  ;;  %v1146_v13 = vsel %vm742_vm4, %v1145_v60, %v1107_v55  ;;  %v2617_v54 = vmul.f32 0.14285715, %v1081_v27 }
 0x1e1   :  { %v1148_v53 = vsel %vm2945_vm3, %v1147_v47, %v1146_v13  ;;  %v1112_v7 = vmul.f32 %v2610_v44, %v2610_v44  ;;  %v1151_v63 = vrot.slane %v1111_v38, 4  ;;  %v962_v25 = vsel %vm954_vm10, %v2453_v14, 0.0 }
 0x1e2   :  { %v1082_v6 = vsub.f32 %v1066_v36, %v2569_v26  ;;  %v1150_v62 = vsel %vm748_vm8, %v1149_v33, %v1148_v53  ;;  %v1113_v0 = vmul.f32 %v2617_v54, %v2617_v54  ;;  %v963_v17 = vrot.slane %v962_v25, 4 }
 0x1e3   :  { %v1152_v12 = vsel %vm751_vm13, %v1151_v63, %v1150_v62  ;;  %v1153_v11 = vrot.slane %v1112_v7, 3  ;;  %v983_v9 = vsel %vm954_vm10, %v2501_v57, 0.0  ;;  %v970_v40 = vrot.slane %v969_v10, 4 }
 0x1e4   :  { %v2614_v16 = vmul.f32 0.14285715, %v1082_v6  ;;  %v1155_v19 = vrot.slane %v1113_v0, 2  ;;  %v990_v36 = vsel %vm954_vm10, %v2508_v29, 0.0  ;;  %v977_v28 = vrot.slane %v976_v42, 4 }
 0x1e5   :  { %v1154_v43 = vsel %vm754_vm14, %v1153_v11, %v1152_v12  ;;  %v955_v46 = vsel %vm954_vm10, %v2463_v18, 0.0  ;;  %v984_v51 = vrot.slane %v983_v9, 4  ;;  %v964_v31 = vadd.f32 %v963_v17, %v962_v25 }
 0x1e6   :  { %v1114_v56 = vmul.f32 %v2614_v16, %v2614_v16  ;;  %v1156_v58 = vsel %vm757_vm11, %v1155_v19, %v1154_v43  ;;  %v991_v60 = vrot.slane %v990_v36, 4  ;;  %v971_v6 = vadd.f32 %v970_v40, %v969_v10  ;;  %v1715_v40 = vld [vmem:[%s2920_s1 + $0x20] sm:$0xff] }
 0x1e7   :  { %v956_v47 = vrot.slane %v955_v46, 4  ;;  %v997_v27 = vsel %vm954_vm10, %v2524_v50, 0.0  ;;  %v978_v55 = vadd.f32 %v977_v28, %v976_v42  ;;  %v985_v33 = vadd.f32 %v984_v51, %v983_v9 }
 0x1e8   :  { %v1157_v4 = vrot.slane %v1114_v56, 1  ;;  %v965_v38 = vrot.slane %v964_v31, 2  ;;  %v992_v13 = vadd.f32 %v991_v60, %v990_v36  ;;  %v972_v53 = vrot.slane %v971_v6, 2 }
 0x1e9   :  { %v998_v7 = vrot.slane %v997_v27, 4  ;;  %v1004_v62 = vsel %vm954_vm10, %v2529_v20, 0.0  ;;  %v957_v63 = vadd.f32 %v956_v47, %v955_v46  ;;  %v979_v56 = vrot.slane %v978_v55, 2 }
 0x1ea   :  { %v1158_v59 = vsel %vm760_vm7, %v1157_v4, %v1156_v58  ;;  %v986_v0 = vrot.slane %v985_v33, 2  ;;  %v966_v12 = vadd.f32 %v965_v38, %v964_v31  ;;  %v1005_v11 = vrot.slane %v1004_v62, 4 }
 0x1eb   :  { %v1164_v39 = vsel %vm954_vm10, %v1158_v59, 0.0  ;;  %v993_v43 = vrot.slane %v992_v13, 2  ;;  %v973_v4 = vadd.f32 %v972_v53, %v971_v6  ;;  %v999_v19 = vadd.f32 %v998_v7, %v997_v27 }
 0x1ec   :  { %v958_v58 = vrot.slane %v957_v63, 2  ;;  %v980_v59 = vadd.f32 %v979_v56, %v978_v55  ;;  %v967_v25 = vrot.slane %v966_v12, 1  ;;  %v1006_v10 = vadd.f32 %v1005_v11, %v1004_v62 }
 0x1ed   :  { %v994_v42 = vadd.f32 %v993_v43, %v992_v13  ;;  %v974_v17 = vrot.slane %v973_v4, 1  ;;  %v1000_v9 = vrot.slane %v999_v19, 2  ;;  %v750_v36 = vrot.slane %v1715_v40, 4 }
 0x1ee   :  { %v959_v28 = vadd.f32 %v958_v58, %v957_v63  ;;  %v981_v46 = vrot.slane %v980_v59, 1  ;;  %v753_v51 = vrot.slane %v2170_v35, 3  ;;  %v756_v60 = vrot.slane %v2210_v34, 2 }
 0x1ef   :  { %v968_v6 = vadd.f32 %v967_v25, %v966_v12  ;;  %v1007_v47 = vrot.slane %v1006_v10, 2  ;;  %v995_v27 = vrot.slane %v994_v42, 1  ;;  %v759_v55 = vrot.slane %v2267_v1, 1 }
 0x1f0   :  { %v1001_v38 = vadd.f32 %v1000_v9, %v999_v19  ;;  %v960_v13 = vrot.slane %v959_v28, 1  ;;  %v982_v53 = vadd.f32 %v981_v46, %v980_v59  ;;  %v752_v7 = vsel %vm751_vm13, %v750_v36, %v2200_v45 }
 0x1f1   :  { %v755_v63 = vsel %vm754_vm14, %v753_v51, %v752_v7  ;;  %v1068_v35 = vsub.f32 %v968_v6, %v2453_v14  ;;  %v1008_v56 = vadd.f32 %v1007_v47, %v1006_v10 }
 0x1f2   :  { %v758_v34 = vsel %vm757_vm11, %v756_v60, %v755_v63  ;;  %v1002_v11 = vrot.slane %v1001_v38, 1  ;;  %v961_v43 = vadd.f32 %v960_v13, %v959_v28 }
 0x1f3   :  { %v761_v1 = vsel %vm760_vm7, %v759_v55, %v758_v34  ;;  %v2664_v19 = vmul.f32 0.14285715, %v1068_v35  ;;  %v1009_v59 = vrot.slane %v1008_v56, 1 }
 0x1f4   :  { %1650 = vmatmul.msk.f32.gmra.mxu3 %vm779_vm1, %v761_v1  ;;  %v1003_v25 = vadd.f32 %v1002_v11, %v1001_v38  ;;  %v1067_v10 = vsub.f32 %v961_v43, %v2463_v18 }
 0x1f5   :  { %v1100_v9 = vmul.f32 %v2664_v19, %v2664_v19  ;;  %v1010_v36 = vadd.f32 %v1009_v59, %v1008_v56 }
 0x1f6   :  { %v1073_v46 = vsub.f32 %v1003_v25, %v2524_v50  ;;  %v2681_v51 = vmul.f32 0.14285715, %v1067_v10 }
 0x1f7   :  { %v1131_v6 = vrot.slane %v1100_v9, 7 }
 0x1f8   :  { %v2690_v38 = vmul.f32 0.14285715, %v1073_v46 }
 0x203   :  { %1165 = vadd.xlane.f32.xlu2 %v1164_v39  ;;  %v987_v39 = vadd.f32 %v986_v0, %v985_v33  ;;  %v975_v33 = vadd.f32 %v974_v17, %v973_v4  ;;  %v996_v0 = vadd.f32 %v995_v27, %v994_v42  ;;  %v1070_v4 = vsub.f32 %v982_v53, %v2486_v21 }
 0x204   :  { %v1074_v27 = vsub.f32 %v1010_v36, %v2529_v20  ;;  %v1099_v53 = vmul.f32 %v2681_v51, %v2681_v51 }
 0x205   :  { %v988_v31 = vrot.slane %v987_v39, 1  ;;  %v1069_v12 = vsub.f32 %v975_v33, %v2468_v5  ;;  %v1072_v58 = vsub.f32 %v996_v0, %v2508_v29  ;;  %v2670_v42 = vmul.f32 0.14285715, %v1070_v4 }
 0x206   :  { %v2695_v63 = vmul.f32 0.14285715, %v1074_v27  ;;  %v1132_v35 = vsel %vm742_vm4, %v1131_v6, %v1099_v53  ;;  %v1105_v0 = vmul.f32 %v2690_v38, %v2690_v38  ;;  %v1421_v53 = vld [vmem:[%s2924_s5 + $0x38] sm:$0xff] }
 0x207   :  { %v989_v62 = vadd.f32 %v988_v31, %v987_v39  ;;  %v2667_v39 = vmul.f32 0.14285715, %v1069_v12  ;;  %v2676_v40 = vmul.f32 0.14285715, %v1072_v58  ;;  %v1102_v31 = vmul.f32 %v2670_v42, %v2670_v42  ;;  %1478 = vmatpush.msra.mxu1 %v1421_v53 }
 0x208   :  { %v1106_v43 = vmul.f32 %v2695_v63, %v2695_v63  ;;  %v1141_v58 = vrot.slane %v1105_v0, 2 }
 0x209   :  { %v1071_v45 = vsub.f32 %v989_v62, %v2501_v57  ;;  %v1101_v28 = vmul.f32 %v2667_v39, %v2667_v39  ;;  %v1104_v55 = vmul.f32 %v2676_v40, %v2676_v40  ;;  %v1135_v7 = vrot.slane %v1102_v31, 5 }
 0x20a   :  { %v1143_v25 = vrot.slane %v1106_v43, 1  ;;  %v1417_v43 = vld [vmem:[%s2924_s5 + $0x18] sm:$0xff] }
 0x20b   :  { %v2672_v17 = vmul.f32 0.14285715, %v1071_v45  ;;  %v1133_v33 = vrot.slane %v1101_v28, 6  ;;  %v1139_v56 = vrot.slane %v1104_v55, 3 }
 0x20d   :  { %v1103_v60 = vmul.f32 %v2672_v17, %v2672_v17  ;;  %v1134_v34 = vsel %vm2946_vm9, %v1133_v33, %v1132_v35 }
 0x20e   :  { %v1136_v11 = vsel %vm748_vm8, %v1135_v7, %v1134_v34  ;;  %v1420_v7 = vld [vmem:[%s2924_s5 + $0x30] sm:$0xff] }
 0x20f   :  { %v1137_v62 = vrot.slane %v1103_v60, 4  ;;  %1479 = vmatpush.msra.mxu1 %v1420_v7 }
 0x211   :  { %v1138_v1 = vsel %vm751_vm13, %v1137_v62, %v1136_v11  ;;  %v1419_v62 = vld [vmem:[%s2924_s5 + $0x28] sm:$0xff]  ;;  %v1418_v11 = vld [vmem:[%s2924_s5 + $0x20] sm:$0xff] }
 0x212   :  { %v1140_v4 = vsel %vm754_vm14, %v1139_v56, %v1138_v1  ;;  %1480 = vmatpush.msra.mxu1 %v1419_v62 }
 0x213   :  { %v1142_v59 = vsel %vm757_vm11, %v1141_v58, %v1140_v4 }
 0x214   :  { %v1144_v10 = vsel %vm760_vm7, %v1143_v25, %v1142_v59  ;;  %1481 = vmatpush.msra.mxu1 %v1418_v11  ;;  %v1416_v25 = vld [vmem:[%s2924_s5 + $0x10] sm:$0xff] }
 0x215   :  { %v1161_v9 = vsel %vm954_vm10, %v1144_v10, 0.0 }
 0x216   :  { %1482 = vmatpush.msra.mxu1 %v1417_v43 }
 0x218   :  { %1483 = vmatpush.msra.mxu1 %v1416_v25 }
 0x234   :  { %v1300_v12 = vpop.permute.xlu2 %1299 }
 0x235   :  { %v1306_v45 = vsel %vm954_vm10, %v1300_v12, 0.0 }
 0x23f   :  { %v1298_v47 = vpop.permute.xlu1 %1297 }
 0x240   :  { %v1303_v13 = vsel %vm954_vm10, %v1298_v47, 0.0 }
 0x241   :  { %1304 = vadd.xlane.f32.xlu0 %v1303_v13 }
 0x249   :  { %1307 = vadd.xlane.f32.xlu0 %v1306_v45 }
 0x251   :  { %1162 = vadd.xlane.f32.xlu0 %v1161_v9  ;;  %v1415_v9 = vld [vmem:[%s2924_s5 + $0x8] sm:$0xff] }
 0x252   :  { %1484 = vmatpush.msra.mxu1 %v1415_v9 }
 0x276   :  { %v1166_v36 = vpop.xlane.xlu2 %1165 }
 0x277   :  { %v1168_v28 = vmax.f32 %v1166_v36, 1e-24  ;;  %v897_v12 = vpop.f32.mrf.mxu3 }
 0x278   :  { %v898_v58 = vadd.f32 %v2444_v8, %v897_v12 }
 0x279   :  { %1703 = vrsqrt.f32 %v1168_v28  ;;  %vm1185_vm2 = vweird.f32 %v1168_v28 }
 0x27a   :  { %vm918_vm6 = vcmp.ge.f32.partialorder %v898_v58, 0.0 }
 0x27f   :  { %v1704_v46 = vpop.eup %1703 }
 0x280   :  { %v1180_v31 = vmul.f32 %v1704_v46, %v1168_v28  ;;  %vm1186_vm0 = vweird.f32 %v1704_v46 }
 0x281   :  { %vm1187_vm5 = vmor %vm1185_vm2, %vm1186_vm0 }
 0x282   :  { %v1181_v60 = vmul.f32 %v1704_v46, %v1180_v31 }
 0x284   :  { %v1182_v6 = vmul.f32 0.5, %v1181_v60 }
 0x286   :  { %v1183_v47 = vsub.f32 1.5, %v1182_v6 }
 0x288   :  { %v1184_v55 = vmul.f32 %v1704_v46, %v1183_v47  ;;  %v1414_v47 = vld [vmem:[%s2924_s5] sm:$0xff] }
 0x289   :  { %1485 = vmatpush.msra.mxu1 %v1414_v47 }
 0x28a   :  { %v2710_v13 = vsel %vm1187_vm5, %v1704_v46, %v1184_v55 }
 0x28b   :  { %v1198_v56 = vrot.slane %v2710_v13, 1  ;;  %v1199_v4 = vrot.slane %v2710_v13, 2  ;;  %v1200_v36 = vrot.slane %v2710_v13, 3  ;;  %v1229_v55 = vmul.f32 %v2710_v13, %v2599_v41 }
 0x28d   :  { %v1230_v59 = vmul.f32 %v1198_v56, %v2587_v24  ;;  %v2742_v28 = vmul.f32 %v1199_v4, %v2589_v30  ;;  %v936_v24 = vmul.f32 %v2447_v49, %v898_v58  ;;  %v1201_v49 = vrot.slane %v2710_v13, 4 }
 0x28e   :  { %v2756_v53 = vmul.f32 %v1200_v36, %v2592_v61 }
 0x28f   :  { %v1452_v31 = vrot.slane %v1230_v59, 7  ;;  %v1454_v7 = vrot.slane %v2742_v28, 6  ;;  %v2759_v56 = vsel %vm918_vm6, %v898_v58, %v936_v24  ;;  %vm2947_vm6 = vcmask 1042434  }
 0x2b4   :  { %v1305_v27 = vpop.xlane.xlu0 %1304 }
 0x2b5   :  { %v1309_v33 = vmax.f32 %v1305_v27, 1e-24 }
 0x2b7   :  { %1705 = vrsqrt.f32 %v1309_v33  ;;  %vm1317_vm12 = vweird.f32 %v1309_v33 }
 0x2bc   :  { %v1308_v35 = vpop.xlane.xlu0 %1307 }
 0x2bd   :  { %v1706_v0 = vpop.eup %1705  ;;  %v2722_v34 = vmax.f32 %v1308_v35, 1e-24 }
 0x2be   :  { %v1312_v1 = vmul.f32 %v1706_v0, %v1309_v33  ;;  %vm1318_vm15 = vweird.f32 %v1706_v0  ;;  %v2762_v33 = vsel %vm742_vm4, %v1452_v31, %v1229_v55 }
 0x2bf   :  { %1707 = vrsqrt.f32 %v2722_v34  ;;  %vm1319_vm3 = vmor %vm1317_vm12, %vm1318_vm15  ;;  %vm1327_vm0 = vweird.f32 %v2722_v34 }
 0x2c0   :  { %v1313_v45 = vmul.f32 %v1706_v0, %v1312_v1 }
 0x2c2   :  { %v1314_v10 = vmul.f32 0.5, %v1313_v45 }
 0x2c4   :  { %v1315_v46 = vsub.f32 1.5, %v1314_v10  ;;  %v1163_v8 = vpop.xlane.xlu0 %1162 }
 0x2c5   :  { %v1708_v60 = vpop.eup %1707  ;;  %v2745_v6 = vmax.f32 %v1163_v8, 1e-24 }
 0x2c6   :  { %v1316_v27 = vmul.f32 %v1706_v0, %v1315_v46  ;;  %v1322_v30 = vmul.f32 %v1708_v60, %v2722_v34  ;;  %vm1328_vm9 = vweird.f32 %v1708_v60 }
 0x2c7   :  { %1709 = vrsqrt.f32 %v2745_v6  ;;  %vm1175_vm2 = vweird.f32 %v2745_v6  ;;  %vm1329_vm5 = vmor %vm1327_vm0, %vm1328_vm9 }
 0x2c8   :  { %v1320_v62 = vsel %vm1319_vm3, %v1706_v0, %v1316_v27  ;;  %v1323_v35 = vmul.f32 %v1708_v60, %v1322_v30  ;;  %vm2948_vm3 = vmmov %vm2947_vm6 }
 0x2c9   :  { %v1333_v12 = vrot.slane %v1320_v62, 1  ;;  %v1334_v41 = vrot.slane %v1320_v62, 2  ;;  %v1335_v11 = vrot.slane %v1320_v62, 3  ;;  %v1336_v1 = vrot.slane %v1320_v62, 4  ;;  %vm2949_vm9 = vmmov %vm2948_vm3 }
 0x2ca   :  { %v1324_v43 = vmul.f32 0.5, %v1323_v35  ;;  %v1337_v4 = vrot.slane %v1320_v62, 5  ;;  %v1338_v45 = vrot.slane %v1320_v62, 6  ;;  %v1339_v59 = vrot.slane %v1320_v62, 7  ;;  %vm2950_vm0 = vmmov %vm2948_vm3 }
 0x2cb   :  { %v1364_v61 = vmul.f32 %v1333_v12, %v2453_v14  ;;  %v1365_v0 = vmul.f32 %v1334_v41, %v2468_v5  ;;  %v1366_v58 = vmul.f32 %v1335_v11, %v2486_v21  ;;  %v1367_v10 = vmul.f32 %v1336_v1, %v2501_v57 }
 0x2cc   :  { %v1325_v25 = vsub.f32 1.5, %v1324_v43  ;;  %v1368_v9 = vmul.f32 %v1337_v4, %v2508_v29  ;;  %v1369_v36 = vmul.f32 %v1338_v45, %v2524_v50  ;;  %v1363_v8 = vmul.f32 %v1320_v62, %v2463_v18 }
 0x2cd   :  { %v1710_v46 = vpop.eup %1709  ;;  %v1531_v24 = vrot.slane %v1364_v61, 7  ;;  %v1533_v31 = vrot.slane %v1365_v0, 6  ;;  %v1370_v5 = vmul.f32 %v1339_v59, %v2529_v20  ;;  %v1535_v21 = vrot.slane %v1366_v58, 5 }
 0x2ce   :  { %v1326_v47 = vmul.f32 %v1708_v60, %v1325_v25  ;;  %v1170_v14 = vmul.f32 %v1710_v46, %v2745_v6  ;;  %vm1176_vm15 = vweird.f32 %v1710_v46  ;;  %v1537_v29 = vrot.slane %v1367_v10, 4 }
 0x2cf   :  { %v1532_v57 = vsel %vm742_vm4, %v1531_v24, %v1363_v8  ;;  %v1539_v50 = vrot.slane %v1368_v9, 3  ;;  %v1541_v30 = vrot.slane %v1369_v36, 2  ;;  %v1543_v4 = vrot.slane %v1370_v5, 1  ;;  %vm1177_vm12 = vmor %vm1175_vm2, %vm1176_vm15 }
 0x2d0   :  { %v1330_v34 = vsel %vm1329_vm5, %v1708_v60, %v1326_v47  ;;  %v1171_v27 = vmul.f32 %v1710_v46, %v1170_v14  ;;  %v1534_v18 = vsel %vm2947_vm6, %v1533_v31, %v1532_v57 }
 0x2d1   :  { %v1536_v55 = vsel %vm748_vm8, %v1535_v21, %v1534_v18  ;;  %v1340_v62 = vrot.slane %v1330_v34, 1  ;;  %v1341_v35 = vrot.slane %v1330_v34, 2  ;;  %v1342_v12 = vrot.slane %v1330_v34, 3 }
 0x2d2   :  { %v1172_v41 = vmul.f32 0.5, %v1171_v27  ;;  %v1538_v20 = vsel %vm751_vm13, %v1537_v29, %v1536_v55  ;;  %v1343_v11 = vrot.slane %v1330_v34, 4  ;;  %v1344_v1 = vrot.slane %v1330_v34, 5 }
 0x2d3   :  { %v1540_v43 = vsel %vm754_vm14, %v1539_v50, %v1538_v20  ;;  %v1345_v45 = vrot.slane %v1330_v34, 6  ;;  %v1346_v59 = vrot.slane %v1330_v34, 7  ;;  %v1372_v0 = vmul.f32 %v1340_v62, %v2493_v3 }
 0x2d4   :  { %v1173_v60 = vsub.f32 1.5, %v1172_v41  ;;  %v1542_v61 = vsel %vm757_vm11, %v1541_v30, %v1540_v43  ;;  %v1373_v58 = vmul.f32 %v1341_v35, %v2510_v23  ;;  %v1374_v10 = vmul.f32 %v1342_v12, %v2520_v2 }
 0x2d5   :  { %v1544_v25 = vsel %vm760_vm7, %v1543_v4, %v1542_v61  ;;  %v1375_v9 = vmul.f32 %v1343_v11, %v2514_v48  ;;  %v1376_v36 = vmul.f32 %v1344_v1, %v2547_v37  ;;  %v1371_v24 = vmul.f32 %v1330_v34, %v2459_v22 }
 0x2d6   :  { %v1174_v8 = vmul.f32 %v1710_v46, %v1173_v60  ;;  %1559 = vrot.lane.b32.xlu1 %v1544_v25, %s1736_s4  ;;  %v1377_v31 = vmul.f32 %v1345_v45, %v2554_v15  ;;  %v1545_v47 = vrot.slane %v1372_v0, 7  ;;  %v2796_v3 = vmul.f32 %v2759_v56, %v2759_v56 }
 0x2d7   :  { %v1378_v23 = vmul.f32 %v1346_v59, %v2569_v26  ;;  %v1547_v48 = vrot.slane %v1373_v58, 6  ;;  %v1549_v2 = vrot.slane %v1374_v10, 5  ;;  %v1551_v5 = vrot.slane %v1375_v9, 4 }
 0x2d8   :  { %v1178_v37 = vsel %vm1177_vm12, %v1710_v46, %v1174_v8  ;;  %v1546_v14 = vsel %vm742_vm4, %v1545_v47, %v1371_v24  ;;  %v1553_v22 = vrot.slane %v1376_v36, 3  ;;  %v1555_v50 = vrot.slane %v1377_v31, 2 }
 0x2d9   :  { %v1191_v21 = vrot.slane %v1178_v37, 1  ;;  %v1548_v15 = vsel %vm2948_vm3, %v1547_v48, %v1546_v14  ;;  %v1192_v57 = vrot.slane %v1178_v37, 2  ;;  %v1193_v29 = vrot.slane %v1178_v37, 3 }
 0x2da   :  { %v1550_v6 = vsel %vm748_vm8, %v1549_v2, %v1548_v15  ;;  %v1194_v34 = vrot.slane %v1178_v37, 4  ;;  %v1195_v27 = vrot.slane %v1178_v37, 5  ;;  %v1557_v26 = vrot.slane %v1378_v23, 1  ;;  %v1512_v2 = vld [vmem:[%s2925_s6 + $0x28] sm:$0xff]  ;;  %v1507_v15 = vld [vmem:[%s2925_s6] sm:$0xff] }
 0x2db   :  { %v1552_v18 = vsel %vm751_vm13, %v1551_v5, %v1550_v6  ;;  %v1196_v30 = vrot.slane %v1178_v37, 6  ;;  %v1222_v46 = vmul.f32 %v1191_v21, %v2664_v19  ;;  %v1197_v62 = vrot.slane %v1178_v37, 7  ;;  %v1510_v5 = vld [vmem:[%s2925_s6 + $0x18] sm:$0xff]  ;;  %v1508_v21 = vld [vmem:[%s2925_s6 + $0x8] sm:$0xff] }
 0x2dc   :  { %v1554_v55 = vsel %vm754_vm14, %v1553_v22, %v1552_v18  ;;  %v1223_v35 = vmul.f32 %v1192_v57, %v2667_v39  ;;  %v1224_v12 = vmul.f32 %v1193_v29, %v2670_v42  ;;  %v1221_v20 = vmul.f32 %v1178_v37, %v2681_v51  ;;  %v1509_v22 = vld [vmem:[%s2925_s6 + $0x10] sm:$0xff] }
 0x2dd   :  { %v1556_v41 = vsel %vm757_vm11, %v1555_v50, %v1554_v55  ;;  %v1225_v11 = vmul.f32 %v1194_v34, %v2672_v17  ;;  %v1202_v1 = vrot.slane %v2710_v13, 5  ;;  %v1226_v43 = vmul.f32 %v1195_v27, %v2676_v40 }
 0x2de   :  { %1396 = vrot.lane.b32.xlu1 %v2796_v3, %s1736_s4  ;;  %v1558_v19 = vsel %vm760_vm7, %v1557_v26, %v1556_v41  ;;  %v1438_v4 = vrot.slane %v1222_v46, 7  ;;  %v1440_v45 = vrot.slane %v1223_v35, 6  ;;  %v1227_v39 = vmul.f32 %v1196_v30, %v2690_v38 }
 0x2df   :  { %1561 = vrot.lane.b32.xlu0 %v1558_v19, %s1736_s4  ;;  %v1233_v42 = vmul.f32 %v1201_v49, %v2604_v32  ;;  %v1455_v17 = vsel %vm2949_vm9, %v1454_v7, %v2762_v33  ;;  %v1228_v51 = vmul.f32 %v1197_v62, %v2695_v63  ;;  %v1442_v40 = vrot.slane %v1224_v12, 5 }
 0x2e0   :  { %v1439_v59 = vsel %vm742_vm4, %v1438_v4, %v1221_v20  ;;  %v1456_v60 = vrot.slane %v2756_v53, 5  ;;  %v1444_v0 = vrot.slane %v1225_v11, 4  ;;  %v1203_v38 = vrot.slane %v2710_v13, 6 }
 0x2e1   :  { %v1441_v61 = vsel %vm2950_vm0, %v1440_v45, %v1439_v59  ;;  %v1446_v32 = vrot.slane %v1226_v43, 3  ;;  %v1234_v49 = vmul.f32 %v1202_v1, %v2610_v44  ;;  %v1448_v63 = vrot.slane %v1227_v39, 2 }
 0x2e2   :  { %v1443_v58 = vsel %vm748_vm8, %v1442_v40, %v1441_v61  ;;  %v1457_v28 = vsel %vm748_vm8, %v1456_v60, %v1455_v17  ;;  %v1458_v33 = vrot.slane %v1233_v42, 4  ;;  %v1450_v10 = vrot.slane %v1228_v51, 1  ;;  %v1716_v40 = vld [vmem:[%s2920_s1 + $0x58] sm:$0xff]  ;;  %v1717_v61 = vld [vmem:[%s2920_s1 + $0x60] sm:$0xff] }
 0x2e3   :  { %v1445_v7 = vsel %vm751_vm13, %v1444_v0, %v1443_v58  ;;  %v1204_v53 = vrot.slane %v2710_v13, 7  ;;  %v1235_v36 = vmul.f32 %v1203_v38, %v2617_v54  ;;  %v1460_v44 = vrot.slane %v1234_v49, 3  ;;  %v1514_v13 = vld [vmem:[%s2925_s6 + $0x38] sm:$0xff]  ;;  %v1513_v54 = vld [vmem:[%s2925_s6 + $0x30] sm:$0xff]  ;;  %v1718_v38 = vld [vmem:[%s2920_s1 + $0x68] sm:$0xff] }
 0x2e4   :  { %v1447_v25 = vsel %vm754_vm14, %v1446_v32, %v1445_v7  ;;  %v1459_v8 = vsel %vm751_vm13, %v1458_v33, %v1457_v28  ;;  %1575 = vmatpush.msrb.mxu2 %v1514_v13  ;;  %v1380_v57 = vsel %vm954_vm10, %v2796_v3, 0.0  ;;  %v766_v60 = vrot.slane %v1716_v40, 5  ;;  %v1719_v32 = vld [vmem:[%s2920_s1 + $0x70] sm:$0xff]  ;;  %v1720_v28 = vld [vmem:[%s2920_s1 + $0x78] sm:$0xff] }
 0x2e5   :  { %v1449_v9 = vsel %vm757_vm11, %v1448_v63, %v1447_v25  ;;  %v1236_v31 = vmul.f32 %v1204_v53, %v2614_v16  ;;  %v1461_v47 = vsel %vm754_vm14, %v1460_v44, %v1459_v8  ;;  %v1462_v23 = vrot.slane %v1235_v36, 2  ;;  %v1511_v16 = vld [vmem:[%s2925_s6 + $0x20] sm:$0xff] }
 0x2e6   :  { %v1451_v24 = vsel %vm760_vm7, %v1450_v10, %v1449_v9  ;;  %1576 = vmatpush.msrb.mxu2 %v1513_v54  ;;  %v768_v0 = vrot.slane %v1717_v61, 4  ;;  %v770_v58 = vrot.slane %v1718_v38, 3  ;;  %v772_v49 = vrot.slane %v1719_v32, 2 }
 0x2e7   :  { %1652 = vmatmul.msk.f32.vlgmr.msra.gmra.mxu1 %vm954_vm10, %v1451_v24  ;;  %v1463_v48 = vsel %vm757_vm11, %v1462_v23, %v1461_v47  ;;  %v1464_v37 = vrot.slane %v1236_v31, 1  ;;  %v774_v7 = vrot.slane %v1720_v28, 1  ;;  %v1501_v36 = vstv %s1616_s26 }
 0x2e8   :  { %1577 = vmatpush.msrb.mxu2 %v1512_v2 }
 0x2e9   :  { %v1465_v14 = vsel %vm760_vm7, %v1464_v37, %v1463_v48 }
 0x2ea   :  { %1578 = vmatpush.msrb.mxu2 %v1511_v16 }
 0x2ec   :  { %1579 = vmatpush.msrb.mxu2 %v1510_v5 }
 0x2ee   :  { %1580 = vmatpush.msrb.mxu2 %v1509_v22 }
 0x2ef   :  { %1653 = vmatmul.msk.f32.gmra.mxu1 %vm954_vm10, %v1465_v14  ;;  %v1602_v14 = vstv %s1617_s29 }
 0x2f0   :  { %1581 = vmatpush.msrb.mxu2 %v1508_v21 }
 0x2f2   :  { %1582 = vmatpush.msrb.mxu2 %v1507_v15 }
 0x309   :  { %1381 = vadd.xlane.f32.xlu0 %v1380_v57 }
 0x348   :  { %v1560_v29 = vpop.permute.xlu1 %1559 }
 0x349   :  { %1654 = vmatmul.msk.f32.vlgmr.msrb.gmra.mxu2 %vm954_vm10, %v1560_v29 }
 0x350   :  { %v1397_v6 = vpop.permute.xlu1 %1396 }
 0x351   :  { %v1562_v50 = vpop.permute.xlu0 %1561  ;;  %v1399_v34 = vsel %vm954_vm10, %v1397_v6, 0.0 }
 0x352   :  { %1655 = vmatmul.msk.f32.gmra.mxu2 %vm954_vm10, %v1562_v50  ;;  %1400 = vadd.xlane.f32.xlu1 %v1399_v34 }
 0x364   :  { %v1487_v41 = vpop.f32.mrf.mxu1 }
 0x37c   :  { %v1382_v27 = vpop.xlane.xlu0 %1381 }
 0x37d   :  { %v1383_v18 = vmax.f32 %v1382_v27, 1e-24 }
 0x37f   :  { %1711 = vrsqrt.f32 %v1383_v18  ;;  %vm1390_vm2 = vweird.f32 %v1383_v18 }
 0x385   :  { %v1712_v26 = vpop.eup %1711 }
 0x386   :  { %v1385_v30 = vmul.f32 %v1712_v26, %v1383_v18  ;;  %vm1391_vm4 = vweird.f32 %v1712_v26 }
 0x387   :  { %vm1392_vm5 = vmor %vm1390_vm2, %vm1391_vm4 }
 0x388   :  { %v1386_v46 = vmul.f32 %v1712_v26, %v1385_v30 }
 0x38a   :  { %v1387_v55 = vmul.f32 0.5, %v1386_v46 }
 0x38c   :  { %v1388_v62 = vsub.f32 1.5, %v1387_v55 }
 0x38e   :  { %v1389_v3 = vmul.f32 %v1712_v26, %v1388_v62 }
 0x390   :  { %v1393_v35 = vsel %vm1392_vm5, %v1712_v26, %v1389_v3 }
 0x391   :  { %v1394_v12 = vmul.f32 %v1393_v35, %v2759_v56 }
 0x393   :  { %v1493_v20 = vmul.f32 %v1487_v41, %v1394_v12 }
 0x395   :  { %v1495_v11 = vsel %vm954_vm10, %v1493_v20, 0.0 }
 0x396   :  { %1496 = vadd.xlane.f32.xlu1 %v1495_v11 }
 0x3c5   :  { %v1401_v1 = vpop.xlane.xlu1 %1400 }
 0x3c6   :  { %v1402_v19 = vmax.f32 %v1401_v1, 1e-24 }
 0x3c8   :  { %1713 = vrsqrt.f32 %v1402_v19  ;;  %vm1409_vm6 = vweird.f32 %v1402_v19 }
 0x3cc   :  { %v1584_v44 = vpop.f32.mrf.mxu2 }
 0x3ce   :  { %v1714_v43 = vpop.eup %1713 }
 0x3cf   :  { %v1404_v4 = vmul.f32 %v1714_v43, %v1402_v19  ;;  %vm1410_vm15 = vweird.f32 %v1714_v43 }
 0x3d0   :  { %vm1411_vm12 = vmor %vm1409_vm6, %vm1410_vm15 }
 0x3d1   :  { %v1405_v45 = vmul.f32 %v1714_v43, %v1404_v4 }
 0x3d3   :  { %v1406_v39 = vmul.f32 0.5, %v1405_v45 }
 0x3d5   :  { %v1407_v42 = vsub.f32 1.5, %v1406_v39  ;;  %v1587_v31 = vpop.f32.mrf.mxu2 }
 0x3d7   :  { %v1408_v17 = vmul.f32 %v1714_v43, %v1407_v42 }
 0x3d9   :  { %v1412_v51 = vsel %vm1411_vm12, %v1714_v43, %v1408_v17 }
 0x3da   :  { %v1413_v59 = vmul.f32 %v1412_v51, %v2759_v56  ;;  %v767_v56 = vsel %vm748_vm8, %v766_v60, %v2107_v52  ;;  %v1490_v52 = vpop.f32.mrf.mxu1  ;;  %vm1504_vm8 = vcmask 7168  }
 0x3db   :  { %v769_v63 = vsel %vm751_vm13, %v768_v0, %v767_v56  ;;  %v1494_v53 = vmul.f32 %v1490_v52, %v1394_v12 }
 0x3dc   :  { %1591 = vrot.lane.b32.xlu2 %v1413_v59, %s1736_s4  ;;  %v771_v33 = vsel %vm754_vm14, %v770_v58, %v769_v63 }
 0x3dd   :  { %v773_v25 = vsel %vm757_vm11, %v772_v49, %v771_v33  ;;  %v1498_v9 = vsel %vm954_vm10, %v1494_v53, 0.0 }
 0x3de   :  { %v775_v10 = vsel %vm760_vm7, %v774_v7, %v773_v25 }
 0x3df   :  { %1651 = vmatmul.msk.f32.gmra.mxu3 %vm779_vm1, %v775_v10 }
 0x405   :  { %1499 = vadd.xlane.f32.xlu2 %v1498_v9 }
 0x409   :  { %v1497_v8 = vpop.xlane.xlu1 %1496 }
 0x40a   :  { %v1502_v24 = vadd.f32 %v1501_v36, %v1497_v8 }
 0x40c   :  { %1505 = vst.msk [vmem:[%s2926_s7] sm:$0xff] %vm1504_vm8, %v1502_v24 }
 0x436   :  { %v1592_v47 = vpop.permute.xlu2 %1591 }
 0x437   :  { %v1594_v23 = vmul.f32 %v1592_v47, %v1584_v44  ;;  %v1595_v13 = vmul.f32 %v1592_v47, %v1587_v31 }
 0x439   :  { %v1599_v54 = vsel %vm954_vm10, %v1595_v13, 0.0  ;;  %v1596_v48 = vsel %vm954_vm10, %v1594_v23, 0.0 }
 0x43a   :  { %1600 = vadd.xlane.f32.xlu0 %v1599_v54  ;;  %1597 = vadd.xlane.f32.xlu1 %v1596_v48 }
 0x462   :  { %v900_v2 = vpop.f32.mrf.mxu3 }
 0x478   :  { %v1500_v37 = vpop.xlane.xlu2 %1499 }
 0x479   :  { %v1503_v16 = vadd.f32 %v1501_v36, %v1500_v37 }
 0x47b   :  { %1506 = vst.msk [vmem:[%s2926_s7 + $0x8] sm:$0xff] %vm1504_vm8, %v1503_v16 }
 0x4ad   :  { %v1598_v5 = vpop.xlane.xlu1 %1597  ;;  %v1601_v22 = vpop.xlane.xlu0 %1600 }
 0x4ae   :  { %v1603_v21 = vadd.f32 %v1602_v14, %v1598_v5  ;;  %v1604_v15 = vadd.f32 %v1602_v14, %v1601_v22 }
 0x4b0   :  { %1605 = vst.msk [vmem:[%s2927_s8] sm:$0xff] %vm1504_vm8, %v1603_v21 }
 0x4b1   :  { %1606 = vst.msk [vmem:[%s2927_s8 + $0x8] sm:$0xff] %vm1504_vm8, %v1604_v15 }
 0x4b2   :  { %1615 = vsyncpa [#allocation3], 1 }

</bundles_post_ra>
